<compile_context>
chip_gen: v6e
topology: v6e:2x2x1
jax: 0.10.0
libtpu: 0.0.40
codegen_flags: <defaults>
</compile_context>

<pallas_src>
import functools
import math

import jax
import jax.numpy as jnp
from jax import lax
from jax.experimental import pallas as pl
from jax.experimental.pallas import tpu as pltpu


def _round_up(x, m):
    return (x + m - 1) // m * m


def _choose_block_b(B, Tq, Tk, target_rows=512):
    """Pick how many batch elements each grid step fuses.

    Large enough that the projection matmuls see a big M dimension, small
    enough to fit VMEM, and (when possible) leaving >=2 grid steps so v7x's two
    TensorCores both get work.
    """
    divs = [d for d in range(1, B + 1) if B % d == 0]
    fitting = [d for d in divs if d * max(Tq, Tk) <= target_rows] or [1]
    block_b = max(fitting)
    alt = [d for d in fitting if B // d >= 2 and d * Tq >= 128]
    if B // block_b < 2 and alt:
        block_b = max(alt)
    return block_b


# ---------------------------------------------------------------------------
# Fused multi-head-attention kernel (block_b batch elements per grid step)
# ---------------------------------------------------------------------------
def _mha_kernel(*refs, num_heads, d_model, mask_mode):
    """Ref shapes (Dp = d_model padded to a multiple of 128):
       q_ref: (block_b, Tq, Dp)   k_ref/v_ref: (block_b, Tk, Dp)
       m_ref: (block_b, 1, Tk) 0/1 key mask  OR  (block_b, Tq, Tk) full mask
       w*_ref: (Dp, Dp) bf16 stored (Din, Dout)   b*_ref: (1, Dp) f32
       o_ref: (block_b, Tq, Dp)
    """
    if mask_mode == "none":
        (q_ref, k_ref, v_ref,
         wq_ref, bq_ref, wk_ref, bk_ref, wv_ref, bv_ref, wo_ref, bo_ref,
         o_ref) = refs
        m_ref = None
    else:
        (q_ref, k_ref, v_ref, m_ref,
         wq_ref, bq_ref, wk_ref, bk_ref, wv_ref, bv_ref, wo_ref, bo_ref,
         o_ref) = refs

    f32, bf16 = jnp.float32, jnp.bfloat16
    block_b, seq_q, Dp = q_ref.shape
    seq_k = k_ref.shape[1]
    d_k = d_model // num_heads

    # Flatten (block_b, T, Dp) -> (block_b*T, Dp): tall M for the projections.
    xq = q_ref[...].reshape(block_b * seq_q, Dp).astype(bf16)
    xk = k_ref[...].reshape(block_b * seq_k, Dp).astype(bf16)
    xv = v_ref[...].reshape(block_b * seq_k, Dp).astype(bf16)

    wq, wk, wv, wo = wq_ref[...], wk_ref[...], wv_ref[...], wo_ref[...]

    # Projections: bf16 operands, f32 accumulation.  1/sqrt(d_k) is already
    # folded into wq/bq at parameter-preparation time.
    q = jnp.dot(xq, wq, preferred_element_type=f32) + bq_ref[...]
    k = jnp.dot(xk, wk, preferred_element_type=f32) + bk_ref[...]
    v = jnp.dot(xv, wv, preferred_element_type=f32) + bv_ref[...]

    neg = jnp.float32(-1e9)
    bo = bo_ref[...]

    for b in range(block_b):                       # static unroll, small
        qb = q[b * seq_q:(b + 1) * seq_q, :]
        kb = k[b * seq_k:(b + 1) * seq_k, :]
        vb = v[b * seq_k:(b + 1) * seq_k, :]
        # (1, Tk) key mask broadcast over Tq, or (Tq, Tk) full mask.
        keep = None if m_ref is None else (m_ref[b] > 0.0)

        yb = jnp.zeros((seq_q, Dp), f32)
        for hd in range(num_heads):                # static unroll
            sl = slice(hd * d_k, (hd + 1) * d_k)
            # scores: contract the last dims directly (no explicit K transpose)
            scores = lax.dot_general(qb[:, sl].astype(bf16),
                                     kb[:, sl].astype(bf16),
                                     (((1,), (1,)), ((), ())),
                                     preferred_element_type=f32)
            if keep is not None:
                scores = jnp.where(keep, scores, neg)   # masked_fill(mask==0,-1e9)
            scores = scores - jnp.max(scores, axis=-1, keepdims=True)
            p = jnp.exp(scores)
            # approx reciprocal uses the EUP slot; ~1e-3 rel error, fine here.
            p = p * pl.reciprocal(jnp.sum(p, axis=-1, keepdims=True), approx=True)
            hv = jnp.dot(p.astype(bf16), vb[:, sl].astype(bf16),
                         preferred_element_type=f32)
            # Fold the head straight into the output projection: no lane-axis
            # concat, each head is consumed as soon as it is produced.
            yb = yb + jnp.dot(hv.astype(bf16), wo[sl, :],
                              preferred_element_type=f32)

        o_ref[b] = (yb + bo).astype(o_ref.dtype)   # lane-dense (Tq, Dp) store


# ---------------------------------------------------------------------------
# Wrapper
# ---------------------------------------------------------------------------
def multi_headed_attention(prepared, query, key, value, mask=None, *,
                           num_heads, block_b=None):
    """query: (B, Tq, D); key/value: (B, Tk, D);
       mask: None, (B, 1, Tk) key-padding mask, or (B, Tq, Tk) full mask.
       `prepared` comes from prepare_params (bf16, padded, scale folded)."""
    B, Tq, D = query.shape
    Tk = key.shape[1]
    assert D % num_heads == 0
    Dp = prepared["wq"].shape[0]                   # lane-dense padded d_model

    if Dp != D:                                    # pad activations with zeros
        pad = ((0, 0), (0, 0), (0, Dp - D))
        query, key, value = (jnp.pad(a, pad) for a in (query, key, value))

    if mask is None:
        mask_mode, mask_arr = "none", None
    elif mask.ndim == 3 and mask.shape[1] == 1:
        # (B, 1, Tk) padding mask: keep it compact, broadcast in-kernel.
        mask_mode = "key"
        mask_arr = jnp.broadcast_to(mask, (B, 1, Tk)).astype(jnp.float32)
    else:
        mask_mode = "full"                         # e.g. causal target mask
        mask_arr = jnp.broadcast_to(mask, (B, Tq, Tk)).astype(jnp.float32)

    if block_b is None:
        block_b = _choose_block_b(B, Tq, Tk)
    assert B % block_b == 0
    grid = (B // block_b,)

    def batch_spec(*tail):
        return pl.BlockSpec((block_b,) + tail, lambda i: (i,) + (0,) * len(tail))

    def const_spec(*shape):
        # Constant index_map: the same weight/bias block is reused every step.
        return pl.BlockSpec(shape, lambda i: (0,) * len(shape))

    in_specs = [batch_spec(Tq, Dp), batch_spec(Tk, Dp), batch_spec(Tk, Dp)]
    args = [query, key, value]
    if mask_mode == "key":
        in_specs.append(batch_spec(1, Tk)); args.append(mask_arr)
    elif mask_mode == "full":
        in_specs.append(batch_spec(Tq, Tk)); args.append(mask_arr)
    in_specs += [const_spec(Dp, Dp), const_spec(1, Dp)] * 4
    args += [prepared["wq"], prepared["bq"], prepared["wk"], prepared["bk"],
             prepared["wv"], prepared["bv"], prepared["wo"], prepared["bo"]]

    kernel = functools.partial(_mha_kernel, num_heads=num_heads, d_model=D,
                               mask_mode=mask_mode)

    out = pl.pallas_call(
        kernel,
        out_shape=jax.ShapeDtypeStruct((B, Tq, Dp), query.dtype),
        grid=grid,
        in_specs=in_specs,
        out_specs=batch_spec(Tq, Dp),
        compiler_params=pltpu.CompilerParams(
            dimension_semantics=("parallel",),
            vmem_limit_bytes=32 * 1024 * 1024),
    )(*args)

    return out[..., :D] if Dp != D else out


# ---------------------------------------------------------------------------
# Parameter preparation (done once, at init time)
# ---------------------------------------------------------------------------
def prepare_params(params, *, num_heads, d_model):
    """Fold 1/sqrt(d_k) into Wq/bq, pad d_model to a multiple of 128 (zeros),
    store weights bf16 (MXU-native) and biases f32."""
    d_k = d_model // num_heads
    scale = 1.0 / math.sqrt(d_k)
    Dp = _round_up(d_model, 128)

    def w(name, s=1.0):
        x = params[name] * s
        x = jnp.pad(x, ((0, Dp - d_model), (0, Dp - d_model)))
        return x.astype(jnp.bfloat16)

    def b(name, s=1.0):
        x = params[name] * s
        x = jnp.pad(x, ((0, 0), (0, Dp - d_model)))
        return x.astype(jnp.float32)

    return {"wq": w("wq", scale), "bq": b("bq", scale),
            "wk": w("wk"), "bk": b("bk"),
            "wv": w("wv"), "bv": b("bv"),
            "wo": w("wo"), "bo": b("bo")}


# ---------------------------------------------------------------------------
# Pure-JAX reference (mirrors the PyTorch module, full f32)
# ---------------------------------------------------------------------------
def mha_reference(params, query, key, value, mask, num_heads):
    B, Tq, D = query.shape
    Tk = key.shape[1]
    d_k = D // num_heads

    def lin(x, w, b):                       # w stored as (Din, Dout)
        return x @ w + b

    q = lin(query, params["wq"], params["bq"]).reshape(B, Tq, num_heads, d_k).transpose(0, 2, 1, 3)
    k = lin(key, params["wk"], params["bk"]).reshape(B, Tk, num_heads, d_k).transpose(0, 2, 1, 3)
    v = lin(value, params["wv"], params["bv"]).reshape(B, Tk, num_heads, d_k).transpose(0, 2, 1, 3)
    scores = jnp.einsum("bhqd,bhkd->bhqk", q, k) / math.sqrt(d_k)
    if mask is not None:
        m = jnp.broadcast_to(mask.astype(jnp.float32), (B, Tq, Tk))[:, None]
        scores = jnp.where(m == 0, -1e9, scores)
    p = jax.nn.softmax(scores, axis=-1)     # dropout on p is identity in eval mode
    x = jnp.einsum("bhqk,bhkd->bhqd", p, v)
    x = x.transpose(0, 2, 1, 3).reshape(B, Tq, D)
    return lin(x, params["wo"], params["bo"])


# ---------------------------------------------------------------------------
# Deterministic parameter construction (weights stored (Din, Dout) == torch W.T)
# ---------------------------------------------------------------------------
def init_mha_params(key, d_model):
    ks = jax.random.split(key, 8)
    s = 1.0 / math.sqrt(d_model)

    def w(k):
        return jax.random.normal(k, (d_model, d_model), jnp.float32) * s

    def b(k):
        return jax.random.normal(k, (1, d_model), jnp.float32) * 0.02

    return {"wq": w(ks[0]), "bq": b(ks[1]),
            "wk": w(ks[2]), "bk": b(ks[3]),
            "wv": w(ks[4]), "bv": b(ks[5]),
            "wo": w(ks[6]), "bo": b(ks[7])}


# ---------------------------------------------------------------------------
# Main
# ---------------------------------------------------------------------------
if __name__ == "__main__":
    B, Tq, Tk = 2, 8, 16
    d_model, h = 32, 4

    root = jax.random.PRNGKey(0)
    kp, kq, kk, kv = jax.random.split(root, 4)
    params = init_mha_params(kp, d_model)
    prepared = prepare_params(params, num_heads=h, d_model=d_model)

    query = jax.random.normal(kq, (B, Tq, d_model), jnp.float32)
    key_in = jax.random.normal(kk, (B, Tk, d_model), jnp.float32)
    value = jax.random.normal(kv, (B, Tk, d_model), jnp.float32)

    # Cross-attention with a source padding mask (batch 1 masks the last 3 keys).
    src_valid = jnp.concatenate(
        [jnp.ones((1, Tk), jnp.float32),
         jnp.concatenate([jnp.ones((1, Tk - 3), jnp.float32),
                          jnp.zeros((1, 3), jnp.float32)], axis=1)], axis=0)
    src_mask = src_valid[:, None, :]                       # (B, 1, Tk)

    out_cross = multi_headed_attention(prepared, query, key_in, value, src_mask,
                                       num_heads=h)
    out_cross = jax.block_until_ready(out_cross)
    ref_cross = mha_reference(params, query, key_in, value, src_mask, h)

    # Self-attention with a causal target mask.
    tgt_mask = jnp.broadcast_to(
        jnp.tril(jnp.ones((Tq, Tq), jnp.float32))[None], (B, Tq, Tq))
    out_self = multi_headed_attention(prepared, query, query, query, tgt_mask,
                                      num_heads=h)
    out_self = jax.block_until_ready(out_self)
    ref_self = mha_reference(params, query, query, query, tgt_mask, h)

    assert out_cross.shape == (B, Tq, d_model)
    assert out_self.shape == (B, Tq, d_model)
    assert bool(jnp.isfinite(out_cross).all()) and bool(jnp.isfinite(out_self).all())
    # bf16 matmul operands + approx reciprocal vs. a full-f32 reference.
    assert bool(jnp.allclose(out_cross, ref_cross, rtol=2e-2, atol=2e-2))
    assert bool(jnp.allclose(out_self, ref_self, rtol=2e-2, atol=2e-2))
    print("KERNEL_OK")
</pallas_src>

<mosaic_0001>
module attributes {stable_mosaic.version = 11 : i64} {
  func.func @_mha_kernel(%arg0: i32, %arg1: memref<2x8x128xf32, #tpu.memory_space<vmem>>, %arg2: memref<2x16x128xf32, #tpu.memory_space<vmem>>, %arg3: memref<2x16x128xf32, #tpu.memory_space<vmem>>, %arg4: memref<2x1x16xf32, #tpu.memory_space<vmem>>, %arg5: memref<128x128xbf16, #tpu.memory_space<vmem>>, %arg6: memref<1x128xf32, #tpu.memory_space<vmem>>, %arg7: memref<128x128xbf16, #tpu.memory_space<vmem>>, %arg8: memref<1x128xf32, #tpu.memory_space<vmem>>, %arg9: memref<128x128xbf16, #tpu.memory_space<vmem>>, %arg10: memref<1x128xf32, #tpu.memory_space<vmem>>, %arg11: memref<128x128xbf16, #tpu.memory_space<vmem>>, %arg12: memref<1x128xf32, #tpu.memory_space<vmem>>, %arg13: memref<2x8x128xf32, #tpu.memory_space<vmem>>) attributes {dimension_semantics = [#tpu.dimension_semantics<parallel>], iteration_bounds = array<i64: 1>, scalar_prefetch = 0 : i64, scratch_operands = 0 : i64, tpu.core_type = #tpu.core_type<tc>, window_params = [{transform_indices = @transform_0, window_bounds = array<i64: 2, 8, 128>}, {transform_indices = @transform_1, window_bounds = array<i64: 2, 16, 128>}, {transform_indices = @transform_2, window_bounds = array<i64: 2, 16, 128>}, {transform_indices = @transform_3, window_bounds = array<i64: 2, 1, 16>}, {pipeline_mode = #tpu.pipeline_mode<synchronous>, transform_indices = @transform_4, window_bounds = array<i64: 128, 128>}, {pipeline_mode = #tpu.pipeline_mode<synchronous>, transform_indices = @transform_5, window_bounds = array<i64: 1, 128>}, {pipeline_mode = #tpu.pipeline_mode<synchronous>, transform_indices = @transform_6, window_bounds = array<i64: 128, 128>}, {pipeline_mode = #tpu.pipeline_mode<synchronous>, transform_indices = @transform_7, window_bounds = array<i64: 1, 128>}, {pipeline_mode = #tpu.pipeline_mode<synchronous>, transform_indices = @transform_8, window_bounds = array<i64: 128, 128>}, {pipeline_mode = #tpu.pipeline_mode<synchronous>, transform_indices = @transform_9, window_bounds = array<i64: 1, 128>}, {pipeline_mode = #tpu.pipeline_mode<synchronous>, transform_indices = @transform_10, window_bounds = array<i64: 128, 128>}, {pipeline_mode = #tpu.pipeline_mode<synchronous>, transform_indices = @transform_11, window_bounds = array<i64: 1, 128>}, {transform_indices = @transform_12, window_bounds = array<i64: 2, 8, 128>}]} {
    %c0 = arith.constant 0 : index
    %c0_0 = arith.constant 0 : index
    %c0_1 = arith.constant 0 : index
    %0 = vector.load %arg1[%c0, %c0_0, %c0_1] : memref<2x8x128xf32, #tpu.memory_space<vmem>>, vector<2x8x128xf32>
    %1 = vector.shape_cast %0 : vector<2x8x128xf32> to vector<16x128xf32>
    %2 = arith.truncf %1 : vector<16x128xf32> to vector<16x128xbf16>
    %c0_2 = arith.constant 0 : index
    %c0_3 = arith.constant 0 : index
    %c0_4 = arith.constant 0 : index
    %3 = vector.load %arg2[%c0_2, %c0_3, %c0_4] : memref<2x16x128xf32, #tpu.memory_space<vmem>>, vector<2x16x128xf32>
    %4 = vector.shape_cast %3 : vector<2x16x128xf32> to vector<32x128xf32>
    %5 = arith.truncf %4 : vector<32x128xf32> to vector<32x128xbf16>
    %c0_5 = arith.constant 0 : index
    %c0_6 = arith.constant 0 : index
    %c0_7 = arith.constant 0 : index
    %6 = vector.load %arg3[%c0_5, %c0_6, %c0_7] : memref<2x16x128xf32, #tpu.memory_space<vmem>>, vector<2x16x128xf32>
    %7 = vector.shape_cast %6 : vector<2x16x128xf32> to vector<32x128xf32>
    %8 = arith.truncf %7 : vector<32x128xf32> to vector<32x128xbf16>
    %c0_8 = arith.constant 0 : index
    %c0_9 = arith.constant 0 : index
    %9 = vector.load %arg5[%c0_8, %c0_9] : memref<128x128xbf16, #tpu.memory_space<vmem>>, vector<128x128xbf16>
    %c0_10 = arith.constant 0 : index
    %c0_11 = arith.constant 0 : index
    %10 = vector.load %arg7[%c0_10, %c0_11] : memref<128x128xbf16, #tpu.memory_space<vmem>>, vector<128x128xbf16>
    %c0_12 = arith.constant 0 : index
    %c0_13 = arith.constant 0 : index
    %11 = vector.load %arg9[%c0_12, %c0_13] : memref<128x128xbf16, #tpu.memory_space<vmem>>, vector<128x128xbf16>
    %c0_14 = arith.constant 0 : index
    %c0_15 = arith.constant 0 : index
    %12 = vector.load %arg11[%c0_14, %c0_15] : memref<128x128xbf16, #tpu.memory_space<vmem>>, vector<128x128xbf16>
    %cst = arith.constant dense<0.000000e+00> : vector<16x128xf32>
    %13 = tpu.matmul %2, %9, %cst {dimension_numbers = #tpu.dot_dimension_numbers<[1], [0], [0], [1], [0, 0, 1, 1], [], []>} : vector<16x128xbf16>, vector<128x128xbf16>, vector<16x128xf32> -> vector<16x128xf32>
    %c0_16 = arith.constant 0 : index
    %c0_17 = arith.constant 0 : index
    %14 = vector.load %arg6[%c0_16, %c0_17] : memref<1x128xf32, #tpu.memory_space<vmem>>, vector<1x128xf32>
    %15 = vector.broadcast %14 : vector<1x128xf32> to vector<16x128xf32>
    %16 = arith.addf %13, %15 : vector<16x128xf32>
    %cst_18 = arith.constant dense<0.000000e+00> : vector<32x128xf32>
    %17 = tpu.matmul %5, %10, %cst_18 {dimension_numbers = #tpu.dot_dimension_numbers<[1], [0], [0], [1], [0, 0, 1, 1], [], []>} : vector<32x128xbf16>, vector<128x128xbf16>, vector<32x128xf32> -> vector<32x128xf32>
    %c0_19 = arith.constant 0 : index
    %c0_20 = arith.constant 0 : index
    %18 = vector.load %arg8[%c0_19, %c0_20] : memref<1x128xf32, #tpu.memory_space<vmem>>, vector<1x128xf32>
    %19 = vector.broadcast %18 : vector<1x128xf32> to vector<32x128xf32>
    %20 = arith.addf %17, %19 : vector<32x128xf32>
    %cst_21 = arith.constant dense<0.000000e+00> : vector<32x128xf32>
    %21 = tpu.matmul %8, %11, %cst_21 {dimension_numbers = #tpu.dot_dimension_numbers<[1], [0], [0], [1], [0, 0, 1, 1], [], []>} : vector<32x128xbf16>, vector<128x128xbf16>, vector<32x128xf32> -> vector<32x128xf32>
    %c0_22 = arith.constant 0 : index
    %c0_23 = arith.constant 0 : index
    %22 = vector.load %arg10[%c0_22, %c0_23] : memref<1x128xf32, #tpu.memory_space<vmem>>, vector<1x128xf32>
    %23 = vector.broadcast %22 : vector<1x128xf32> to vector<32x128xf32>
    %24 = arith.addf %21, %23 : vector<32x128xf32>
    %c0_24 = arith.constant 0 : index
    %c0_25 = arith.constant 0 : index
    %25 = vector.load %arg12[%c0_24, %c0_25] : memref<1x128xf32, #tpu.memory_space<vmem>>, vector<1x128xf32>
    %26 = vector.extract_strided_slice %16 {offsets = [0, 0], sizes = [8, 128], strides = [1, 1]} : vector<16x128xf32> to vector<8x128xf32>
    %27 = vector.extract_strided_slice %20 {offsets = [0, 0], sizes = [16, 128], strides = [1, 1]} : vector<32x128xf32> to vector<16x128xf32>
    %28 = vector.extract_strided_slice %24 {offsets = [0, 0], sizes = [16, 128], strides = [1, 1]} : vector<32x128xf32> to vector<16x128xf32>
    %c0_26 = arith.constant 0 : index
    %c0_27 = arith.constant 0 : index
    %c0_28 = arith.constant 0 : index
    %29 = vector.load %arg4[%c0_26, %c0_27, %c0_28] : memref<2x1x16xf32, #tpu.memory_space<vmem>>, vector<1x1x16xf32>
    %30 = vector.shape_cast %29 : vector<1x1x16xf32> to vector<1x16xf32>
    %cst_29 = arith.constant 0.000000e+00 : f32
    %31 = vector.broadcast %cst_29 : f32 to vector<1x16xf32>
    %32 = arith.cmpf ogt, %30, %31 : vector<1x16xf32>
    %cst_30 = arith.constant 0.000000e+00 : f32
    %33 = vector.broadcast %cst_30 : f32 to vector<8x128xf32>
    %34 = vector.extract_strided_slice %26 {offsets = [0, 0], sizes = [8, 8], strides = [1, 1]} : vector<8x128xf32> to vector<8x8xf32>
    %35 = arith.truncf %34 : vector<8x8xf32> to vector<8x8xbf16>
    %36 = vector.extract_strided_slice %27 {offsets = [0, 0], sizes = [16, 8], strides = [1, 1]} : vector<16x128xf32> to vector<16x8xf32>
    %37 = arith.truncf %36 : vector<16x8xf32> to vector<16x8xbf16>
    %cst_31 = arith.constant dense<0.000000e+00> : vector<8x16xf32>
    %38 = tpu.matmul %35, %37, %cst_31 {dimension_numbers = #tpu.dot_dimension_numbers<[1], [1], [0], [0], [0, 0, 1, 0], [], []>} : vector<8x8xbf16>, vector<16x8xbf16>, vector<8x16xf32> -> vector<8x16xf32>
    %cst_32 = arith.constant -1.000000e+09 : f32
    %39 = vector.shape_cast %32 : vector<1x16xi1> to vector<1x16xi1>
    %40 = vector.broadcast %39 : vector<1x16xi1> to vector<8x16xi1>
    %41 = vector.broadcast %cst_32 : f32 to vector<8x16xf32>
    %42 = arith.select %40, %38, %41 : vector<8x16xi1>, vector<8x16xf32>
    %cst_33 = arith.constant dense<0xFF800000> : vector<8xf32>
    %43 = vector.multi_reduction <maximumf>, %42, %cst_33 [1] : vector<8x16xf32> to vector<8xf32>
    %44 = vector.shape_cast %43 : vector<8xf32> to vector<8x1xf32>
    %45 = vector.broadcast %44 : vector<8x1xf32> to vector<8x16xf32>
    %46 = arith.subf %42, %45 : vector<8x16xf32>
    %47 = math.exp %46 : vector<8x16xf32>
    %cst_34 = arith.constant dense<0.000000e+00> : vector<8xf32>
    %48 = vector.multi_reduction <add>, %47, %cst_34 [1] : vector<8x16xf32> to vector<8xf32>
    %49 = vector.shape_cast %48 : vector<8xf32> to vector<8x1xf32>
    %50 = tpu.reciprocal %49 {approx = true} : vector<8x1xf32> -> vector<8x1xf32>
    %51 = vector.broadcast %50 : vector<8x1xf32> to vector<8x16xf32>
    %52 = arith.mulf %47, %51 : vector<8x16xf32>
    %53 = arith.truncf %52 : vector<8x16xf32> to vector<8x16xbf16>
    %54 = vector.extract_strided_slice %28 {offsets = [0, 0], sizes = [16, 8], strides = [1, 1]} : vector<16x128xf32> to vector<16x8xf32>
    %55 = arith.truncf %54 : vector<16x8xf32> to vector<16x8xbf16>
    %cst_35 = arith.constant dense<0.000000e+00> : vector<8x8xf32>
    %56 = tpu.matmul %53, %55, %cst_35 {dimension_numbers = #tpu.dot_dimension_numbers<[1], [0], [0], [1], [0, 0, 1, 1], [], []>} : vector<8x16xbf16>, vector<16x8xbf16>, vector<8x8xf32> -> vector<8x8xf32>
    %57 = arith.truncf %56 : vector<8x8xf32> to vector<8x8xbf16>
    %58 = vector.extract_strided_slice %12 {offsets = [0, 0], sizes = [8, 128], strides = [1, 1]} : vector<128x128xbf16> to vector<8x128xbf16>
    %cst_36 = arith.constant dense<0.000000e+00> : vector<8x128xf32>
    %59 = tpu.matmul %57, %58, %cst_36 {dimension_numbers = #tpu.dot_dimension_numbers<[1], [0], [0], [1], [0, 0, 1, 1], [], []>} : vector<8x8xbf16>, vector<8x128xbf16>, vector<8x128xf32> -> vector<8x128xf32>
    %60 = arith.addf %33, %59 : vector<8x128xf32>
    %61 = vector.extract_strided_slice %26 {offsets = [0, 8], sizes = [8, 8], strides = [1, 1]} : vector<8x128xf32> to vector<8x8xf32>
    %62 = arith.truncf %61 : vector<8x8xf32> to vector<8x8xbf16>
    %63 = vector.extract_strided_slice %27 {offsets = [0, 8], sizes = [16, 8], strides = [1, 1]} : vector<16x128xf32> to vector<16x8xf32>
    %64 = arith.truncf %63 : vector<16x8xf32> to vector<16x8xbf16>
    %cst_37 = arith.constant dense<0.000000e+00> : vector<8x16xf32>
    %65 = tpu.matmul %62, %64, %cst_37 {dimension_numbers = #tpu.dot_dimension_numbers<[1], [1], [0], [0], [0, 0, 1, 0], [], []>} : vector<8x8xbf16>, vector<16x8xbf16>, vector<8x16xf32> -> vector<8x16xf32>
    %cst_38 = arith.constant -1.000000e+09 : f32
    %66 = vector.shape_cast %32 : vector<1x16xi1> to vector<1x16xi1>
    %67 = vector.broadcast %66 : vector<1x16xi1> to vector<8x16xi1>
    %68 = vector.broadcast %cst_38 : f32 to vector<8x16xf32>
    %69 = arith.select %67, %65, %68 : vector<8x16xi1>, vector<8x16xf32>
    %cst_39 = arith.constant dense<0xFF800000> : vector<8xf32>
    %70 = vector.multi_reduction <maximumf>, %69, %cst_39 [1] : vector<8x16xf32> to vector<8xf32>
    %71 = vector.shape_cast %70 : vector<8xf32> to vector<8x1xf32>
    %72 = vector.broadcast %71 : vector<8x1xf32> to vector<8x16xf32>
    %73 = arith.subf %69, %72 : vector<8x16xf32>
    %74 = math.exp %73 : vector<8x16xf32>
    %cst_40 = arith.constant dense<0.000000e+00> : vector<8xf32>
    %75 = vector.multi_reduction <add>, %74, %cst_40 [1] : vector<8x16xf32> to vector<8xf32>
    %76 = vector.shape_cast %75 : vector<8xf32> to vector<8x1xf32>
    %77 = tpu.reciprocal %76 {approx = true} : vector<8x1xf32> -> vector<8x1xf32>
    %78 = vector.broadcast %77 : vector<8x1xf32> to vector<8x16xf32>
    %79 = arith.mulf %74, %78 : vector<8x16xf32>
    %80 = arith.truncf %79 : vector<8x16xf32> to vector<8x16xbf16>
    %81 = vector.extract_strided_slice %28 {offsets = [0, 8], sizes = [16, 8], strides = [1, 1]} : vector<16x128xf32> to vector<16x8xf32>
    %82 = arith.truncf %81 : vector<16x8xf32> to vector<16x8xbf16>
    %cst_41 = arith.constant dense<0.000000e+00> : vector<8x8xf32>
    %83 = tpu.matmul %80, %82, %cst_41 {dimension_numbers = #tpu.dot_dimension_numbers<[1], [0], [0], [1], [0, 0, 1, 1], [], []>} : vector<8x16xbf16>, vector<16x8xbf16>, vector<8x8xf32> -> vector<8x8xf32>
    %84 = arith.truncf %83 : vector<8x8xf32> to vector<8x8xbf16>
    %85 = vector.extract_strided_slice %12 {offsets = [8, 0], sizes = [8, 128], strides = [1, 1]} : vector<128x128xbf16> to vector<8x128xbf16>
    %cst_42 = arith.constant dense<0.000000e+00> : vector<8x128xf32>
    %86 = tpu.matmul %84, %85, %cst_42 {dimension_numbers = #tpu.dot_dimension_numbers<[1], [0], [0], [1], [0, 0, 1, 1], [], []>} : vector<8x8xbf16>, vector<8x128xbf16>, vector<8x128xf32> -> vector<8x128xf32>
    %87 = arith.addf %60, %86 : vector<8x128xf32>
    %88 = vector.extract_strided_slice %26 {offsets = [0, 16], sizes = [8, 8], strides = [1, 1]} : vector<8x128xf32> to vector<8x8xf32>
    %89 = arith.truncf %88 : vector<8x8xf32> to vector<8x8xbf16>
    %90 = vector.extract_strided_slice %27 {offsets = [0, 16], sizes = [16, 8], strides = [1, 1]} : vector<16x128xf32> to vector<16x8xf32>
    %91 = arith.truncf %90 : vector<16x8xf32> to vector<16x8xbf16>
    %cst_43 = arith.constant dense<0.000000e+00> : vector<8x16xf32>
    %92 = tpu.matmul %89, %91, %cst_43 {dimension_numbers = #tpu.dot_dimension_numbers<[1], [1], [0], [0], [0, 0, 1, 0], [], []>} : vector<8x8xbf16>, vector<16x8xbf16>, vector<8x16xf32> -> vector<8x16xf32>
    %cst_44 = arith.constant -1.000000e+09 : f32
    %93 = vector.shape_cast %32 : vector<1x16xi1> to vector<1x16xi1>
    %94 = vector.broadcast %93 : vector<1x16xi1> to vector<8x16xi1>
    %95 = vector.broadcast %cst_44 : f32 to vector<8x16xf32>
    %96 = arith.select %94, %92, %95 : vector<8x16xi1>, vector<8x16xf32>
    %cst_45 = arith.constant dense<0xFF800000> : vector<8xf32>
    %97 = vector.multi_reduction <maximumf>, %96, %cst_45 [1] : vector<8x16xf32> to vector<8xf32>
    %98 = vector.shape_cast %97 : vector<8xf32> to vector<8x1xf32>
    %99 = vector.broadcast %98 : vector<8x1xf32> to vector<8x16xf32>
    %100 = arith.subf %96, %99 : vector<8x16xf32>
    %101 = math.exp %100 : vector<8x16xf32>
    %cst_46 = arith.constant dense<0.000000e+00> : vector<8xf32>
    %102 = vector.multi_reduction <add>, %101, %cst_46 [1] : vector<8x16xf32> to vector<8xf32>
    %103 = vector.shape_cast %102 : vector<8xf32> to vector<8x1xf32>
    %104 = tpu.reciprocal %103 {approx = true} : vector<8x1xf32> -> vector<8x1xf32>
    %105 = vector.broadcast %104 : vector<8x1xf32> to vector<8x16xf32>
    %106 = arith.mulf %101, %105 : vector<8x16xf32>
    %107 = arith.truncf %106 : vector<8x16xf32> to vector<8x16xbf16>
    %108 = vector.extract_strided_slice %28 {offsets = [0, 16], sizes = [16, 8], strides = [1, 1]} : vector<16x128xf32> to vector<16x8xf32>
    %109 = arith.truncf %108 : vector<16x8xf32> to vector<16x8xbf16>
    %cst_47 = arith.constant dense<0.000000e+00> : vector<8x8xf32>
    %110 = tpu.matmul %107, %109, %cst_47 {dimension_numbers = #tpu.dot_dimension_numbers<[1], [0], [0], [1], [0, 0, 1, 1], [], []>} : vector<8x16xbf16>, vector<16x8xbf16>, vector<8x8xf32> -> vector<8x8xf32>
    %111 = arith.truncf %110 : vector<8x8xf32> to vector<8x8xbf16>
    %112 = vector.extract_strided_slice %12 {offsets = [16, 0], sizes = [8, 128], strides = [1, 1]} : vector<128x128xbf16> to vector<8x128xbf16>
    %cst_48 = arith.constant dense<0.000000e+00> : vector<8x128xf32>
    %113 = tpu.matmul %111, %112, %cst_48 {dimension_numbers = #tpu.dot_dimension_numbers<[1], [0], [0], [1], [0, 0, 1, 1], [], []>} : vector<8x8xbf16>, vector<8x128xbf16>, vector<8x128xf32> -> vector<8x128xf32>
    %114 = arith.addf %87, %113 : vector<8x128xf32>
    %115 = vector.extract_strided_slice %26 {offsets = [0, 24], sizes = [8, 8], strides = [1, 1]} : vector<8x128xf32> to vector<8x8xf32>
    %116 = arith.truncf %115 : vector<8x8xf32> to vector<8x8xbf16>
    %117 = vector.extract_strided_slice %27 {offsets = [0, 24], sizes = [16, 8], strides = [1, 1]} : vector<16x128xf32> to vector<16x8xf32>
    %118 = arith.truncf %117 : vector<16x8xf32> to vector<16x8xbf16>
    %cst_49 = arith.constant dense<0.000000e+00> : vector<8x16xf32>
    %119 = tpu.matmul %116, %118, %cst_49 {dimension_numbers = #tpu.dot_dimension_numbers<[1], [1], [0], [0], [0, 0, 1, 0], [], []>} : vector<8x8xbf16>, vector<16x8xbf16>, vector<8x16xf32> -> vector<8x16xf32>
    %cst_50 = arith.constant -1.000000e+09 : f32
    %120 = vector.shape_cast %32 : vector<1x16xi1> to vector<1x16xi1>
    %121 = vector.broadcast %120 : vector<1x16xi1> to vector<8x16xi1>
    %122 = vector.broadcast %cst_50 : f32 to vector<8x16xf32>
    %123 = arith.select %121, %119, %122 : vector<8x16xi1>, vector<8x16xf32>
    %cst_51 = arith.constant dense<0xFF800000> : vector<8xf32>
    %124 = vector.multi_reduction <maximumf>, %123, %cst_51 [1] : vector<8x16xf32> to vector<8xf32>
    %125 = vector.shape_cast %124 : vector<8xf32> to vector<8x1xf32>
    %126 = vector.broadcast %125 : vector<8x1xf32> to vector<8x16xf32>
    %127 = arith.subf %123, %126 : vector<8x16xf32>
    %128 = math.exp %127 : vector<8x16xf32>
    %cst_52 = arith.constant dense<0.000000e+00> : vector<8xf32>
    %129 = vector.multi_reduction <add>, %128, %cst_52 [1] : vector<8x16xf32> to vector<8xf32>
    %130 = vector.shape_cast %129 : vector<8xf32> to vector<8x1xf32>
    %131 = tpu.reciprocal %130 {approx = true} : vector<8x1xf32> -> vector<8x1xf32>
    %132 = vector.broadcast %131 : vector<8x1xf32> to vector<8x16xf32>
    %133 = arith.mulf %128, %132 : vector<8x16xf32>
    %134 = arith.truncf %133 : vector<8x16xf32> to vector<8x16xbf16>
    %135 = vector.extract_strided_slice %28 {offsets = [0, 24], sizes = [16, 8], strides = [1, 1]} : vector<16x128xf32> to vector<16x8xf32>
    %136 = arith.truncf %135 : vector<16x8xf32> to vector<16x8xbf16>
    %cst_53 = arith.constant dense<0.000000e+00> : vector<8x8xf32>
    %137 = tpu.matmul %134, %136, %cst_53 {dimension_numbers = #tpu.dot_dimension_numbers<[1], [0], [0], [1], [0, 0, 1, 1], [], []>} : vector<8x16xbf16>, vector<16x8xbf16>, vector<8x8xf32> -> vector<8x8xf32>
    %138 = arith.truncf %137 : vector<8x8xf32> to vector<8x8xbf16>
    %139 = vector.extract_strided_slice %12 {offsets = [24, 0], sizes = [8, 128], strides = [1, 1]} : vector<128x128xbf16> to vector<8x128xbf16>
    %cst_54 = arith.constant dense<0.000000e+00> : vector<8x128xf32>
    %140 = tpu.matmul %138, %139, %cst_54 {dimension_numbers = #tpu.dot_dimension_numbers<[1], [0], [0], [1], [0, 0, 1, 1], [], []>} : vector<8x8xbf16>, vector<8x128xbf16>, vector<8x128xf32> -> vector<8x128xf32>
    %141 = arith.addf %114, %140 : vector<8x128xf32>
    %142 = vector.broadcast %25 : vector<1x128xf32> to vector<8x128xf32>
    %143 = arith.addf %141, %142 : vector<8x128xf32>
    %c0_55 = arith.constant 0 : index
    %c0_56 = arith.constant 0 : index
    %c0_57 = arith.constant 0 : index
    %144 = vector.load %arg13[%c0_55, %c0_56, %c0_57] : memref<2x8x128xf32, #tpu.memory_space<vmem>>, vector<1x8x128xf32>
    %145 = vector.shape_cast %144 : vector<1x8x128xf32> to vector<8x128xf32>
    %146 = vector.shape_cast %143 : vector<8x128xf32> to vector<1x8x128xf32>
    tpu.vector_store %arg13[%c0_55, %c0_56, %c0_57], %146 {strides = array<i32>} : memref<2x8x128xf32, #tpu.memory_space<vmem>>, vector<1x8x128xf32>,
    %147 = vector.extract_strided_slice %16 {offsets = [8, 0], sizes = [8, 128], strides = [1, 1]} : vector<16x128xf32> to vector<8x128xf32>
    %148 = vector.extract_strided_slice %20 {offsets = [16, 0], sizes = [16, 128], strides = [1, 1]} : vector<32x128xf32> to vector<16x128xf32>
    %149 = vector.extract_strided_slice %24 {offsets = [16, 0], sizes = [16, 128], strides = [1, 1]} : vector<32x128xf32> to vector<16x128xf32>
    %c1 = arith.constant 1 : index
    %c0_58 = arith.constant 0 : index
    %c0_59 = arith.constant 0 : index
    %150 = vector.load %arg4[%c1, %c0_58, %c0_59] : memref<2x1x16xf32, #tpu.memory_space<vmem>>, vector<1x1x16xf32>
    %151 = vector.shape_cast %150 : vector<1x1x16xf32> to vector<1x16xf32>
    %cst_60 = arith.constant 0.000000e+00 : f32
    %152 = vector.broadcast %cst_60 : f32 to vector<1x16xf32>
    %153 = arith.cmpf ogt, %151, %152 : vector<1x16xf32>
    %cst_61 = arith.constant 0.000000e+00 : f32
    %154 = vector.broadcast %cst_61 : f32 to vector<8x128xf32>
    %155 = vector.extract_strided_slice %147 {offsets = [0, 0], sizes = [8, 8], strides = [1, 1]} : vector<8x128xf32> to vector<8x8xf32>
    %156 = arith.truncf %155 : vector<8x8xf32> to vector<8x8xbf16>
    %157 = vector.extract_strided_slice %148 {offsets = [0, 0], sizes = [16, 8], strides = [1, 1]} : vector<16x128xf32> to vector<16x8xf32>
    %158 = arith.truncf %157 : vector<16x8xf32> to vector<16x8xbf16>
    %cst_62 = arith.constant dense<0.000000e+00> : vector<8x16xf32>
    %159 = tpu.matmul %156, %158, %cst_62 {dimension_numbers = #tpu.dot_dimension_numbers<[1], [1], [0], [0], [0, 0, 1, 0], [], []>} : vector<8x8xbf16>, vector<16x8xbf16>, vector<8x16xf32> -> vector<8x16xf32>
    %cst_63 = arith.constant -1.000000e+09 : f32
    %160 = vector.shape_cast %153 : vector<1x16xi1> to vector<1x16xi1>
    %161 = vector.broadcast %160 : vector<1x16xi1> to vector<8x16xi1>
    %162 = vector.broadcast %cst_63 : f32 to vector<8x16xf32>
    %163 = arith.select %161, %159, %162 : vector<8x16xi1>, vector<8x16xf32>
    %cst_64 = arith.constant dense<0xFF800000> : vector<8xf32>
    %164 = vector.multi_reduction <maximumf>, %163, %cst_64 [1] : vector<8x16xf32> to vector<8xf32>
    %165 = vector.shape_cast %164 : vector<8xf32> to vector<8x1xf32>
    %166 = vector.broadcast %165 : vector<8x1xf32> to vector<8x16xf32>
    %167 = arith.subf %163, %166 : vector<8x16xf32>
    %168 = math.exp %167 : vector<8x16xf32>
    %cst_65 = arith.constant dense<0.000000e+00> : vector<8xf32>
    %169 = vector.multi_reduction <add>, %168, %cst_65 [1] : vector<8x16xf32> to vector<8xf32>
    %170 = vector.shape_cast %169 : vector<8xf32> to vector<8x1xf32>
    %171 = tpu.reciprocal %170 {approx = true} : vector<8x1xf32> -> vector<8x1xf32>
    %172 = vector.broadcast %171 : vector<8x1xf32> to vector<8x16xf32>
    %173 = arith.mulf %168, %172 : vector<8x16xf32>
    %174 = arith.truncf %173 : vector<8x16xf32> to vector<8x16xbf16>
    %175 = vector.extract_strided_slice %149 {offsets = [0, 0], sizes = [16, 8], strides = [1, 1]} : vector<16x128xf32> to vector<16x8xf32>
    %176 = arith.truncf %175 : vector<16x8xf32> to vector<16x8xbf16>
    %cst_66 = arith.constant dense<0.000000e+00> : vector<8x8xf32>
    %177 = tpu.matmul %174, %176, %cst_66 {dimension_numbers = #tpu.dot_dimension_numbers<[1], [0], [0], [1], [0, 0, 1, 1], [], []>} : vector<8x16xbf16>, vector<16x8xbf16>, vector<8x8xf32> -> vector<8x8xf32>
    %178 = arith.truncf %177 : vector<8x8xf32> to vector<8x8xbf16>
    %179 = vector.extract_strided_slice %12 {offsets = [0, 0], sizes = [8, 128], strides = [1, 1]} : vector<128x128xbf16> to vector<8x128xbf16>
    %cst_67 = arith.constant dense<0.000000e+00> : vector<8x128xf32>
    %180 = tpu.matmul %178, %179, %cst_67 {dimension_numbers = #tpu.dot_dimension_numbers<[1], [0], [0], [1], [0, 0, 1, 1], [], []>} : vector<8x8xbf16>, vector<8x128xbf16>, vector<8x128xf32> -> vector<8x128xf32>
    %181 = arith.addf %154, %180 : vector<8x128xf32>
    %182 = vector.extract_strided_slice %147 {offsets = [0, 8], sizes = [8, 8], strides = [1, 1]} : vector<8x128xf32> to vector<8x8xf32>
    %183 = arith.truncf %182 : vector<8x8xf32> to vector<8x8xbf16>
    %184 = vector.extract_strided_slice %148 {offsets = [0, 8], sizes = [16, 8], strides = [1, 1]} : vector<16x128xf32> to vector<16x8xf32>
    %185 = arith.truncf %184 : vector<16x8xf32> to vector<16x8xbf16>
    %cst_68 = arith.constant dense<0.000000e+00> : vector<8x16xf32>
    %186 = tpu.matmul %183, %185, %cst_68 {dimension_numbers = #tpu.dot_dimension_numbers<[1], [1], [0], [0], [0, 0, 1, 0], [], []>} : vector<8x8xbf16>, vector<16x8xbf16>, vector<8x16xf32> -> vector<8x16xf32>
    %cst_69 = arith.constant -1.000000e+09 : f32
    %187 = vector.shape_cast %153 : vector<1x16xi1> to vector<1x16xi1>
    %188 = vector.broadcast %187 : vector<1x16xi1> to vector<8x16xi1>
    %189 = vector.broadcast %cst_69 : f32 to vector<8x16xf32>
    %190 = arith.select %188, %186, %189 : vector<8x16xi1>, vector<8x16xf32>
    %cst_70 = arith.constant dense<0xFF800000> : vector<8xf32>
    %191 = vector.multi_reduction <maximumf>, %190, %cst_70 [1] : vector<8x16xf32> to vector<8xf32>
    %192 = vector.shape_cast %191 : vector<8xf32> to vector<8x1xf32>
    %193 = vector.broadcast %192 : vector<8x1xf32> to vector<8x16xf32>
    %194 = arith.subf %190, %193 : vector<8x16xf32>
    %195 = math.exp %194 : vector<8x16xf32>
    %cst_71 = arith.constant dense<0.000000e+00> : vector<8xf32>
    %196 = vector.multi_reduction <add>, %195, %cst_71 [1] : vector<8x16xf32> to vector<8xf32>
    %197 = vector.shape_cast %196 : vector<8xf32> to vector<8x1xf32>
    %198 = tpu.reciprocal %197 {approx = true} : vector<8x1xf32> -> vector<8x1xf32>
    %199 = vector.broadcast %198 : vector<8x1xf32> to vector<8x16xf32>
    %200 = arith.mulf %195, %199 : vector<8x16xf32>
    %201 = arith.truncf %200 : vector<8x16xf32> to vector<8x16xbf16>
    %202 = vector.extract_strided_slice %149 {offsets = [0, 8], sizes = [16, 8], strides = [1, 1]} : vector<16x128xf32> to vector<16x8xf32>
    %203 = arith.truncf %202 : vector<16x8xf32> to vector<16x8xbf16>
    %cst_72 = arith.constant dense<0.000000e+00> : vector<8x8xf32>
    %204 = tpu.matmul %201, %203, %cst_72 {dimension_numbers = #tpu.dot_dimension_numbers<[1], [0], [0], [1], [0, 0, 1, 1], [], []>} : vector<8x16xbf16>, vector<16x8xbf16>, vector<8x8xf32> -> vector<8x8xf32>
    %205 = arith.truncf %204 : vector<8x8xf32> to vector<8x8xbf16>
    %206 = vector.extract_strided_slice %12 {offsets = [8, 0], sizes = [8, 128], strides = [1, 1]} : vector<128x128xbf16> to vector<8x128xbf16>
    %cst_73 = arith.constant dense<0.000000e+00> : vector<8x128xf32>
    %207 = tpu.matmul %205, %206, %cst_73 {dimension_numbers = #tpu.dot_dimension_numbers<[1], [0], [0], [1], [0, 0, 1, 1], [], []>} : vector<8x8xbf16>, vector<8x128xbf16>, vector<8x128xf32> -> vector<8x128xf32>
    %208 = arith.addf %181, %207 : vector<8x128xf32>
    %209 = vector.extract_strided_slice %147 {offsets = [0, 16], sizes = [8, 8], strides = [1, 1]} : vector<8x128xf32> to vector<8x8xf32>
    %210 = arith.truncf %209 : vector<8x8xf32> to vector<8x8xbf16>
    %211 = vector.extract_strided_slice %148 {offsets = [0, 16], sizes = [16, 8], strides = [1, 1]} : vector<16x128xf32> to vector<16x8xf32>
    %212 = arith.truncf %211 : vector<16x8xf32> to vector<16x8xbf16>
    %cst_74 = arith.constant dense<0.000000e+00> : vector<8x16xf32>
    %213 = tpu.matmul %210, %212, %cst_74 {dimension_numbers = #tpu.dot_dimension_numbers<[1], [1], [0], [0], [0, 0, 1, 0], [], []>} : vector<8x8xbf16>, vector<16x8xbf16>, vector<8x16xf32> -> vector<8x16xf32>
    %cst_75 = arith.constant -1.000000e+09 : f32
    %214 = vector.shape_cast %153 : vector<1x16xi1> to vector<1x16xi1>
    %215 = vector.broadcast %214 : vector<1x16xi1> to vector<8x16xi1>
    %216 = vector.broadcast %cst_75 : f32 to vector<8x16xf32>
    %217 = arith.select %215, %213, %216 : vector<8x16xi1>, vector<8x16xf32>
    %cst_76 = arith.constant dense<0xFF800000> : vector<8xf32>
    %218 = vector.multi_reduction <maximumf>, %217, %cst_76 [1] : vector<8x16xf32> to vector<8xf32>
    %219 = vector.shape_cast %218 : vector<8xf32> to vector<8x1xf32>
    %220 = vector.broadcast %219 : vector<8x1xf32> to vector<8x16xf32>
    %221 = arith.subf %217, %220 : vector<8x16xf32>
    %222 = math.exp %221 : vector<8x16xf32>
    %cst_77 = arith.constant dense<0.000000e+00> : vector<8xf32>
    %223 = vector.multi_reduction <add>, %222, %cst_77 [1] : vector<8x16xf32> to vector<8xf32>
    %224 = vector.shape_cast %223 : vector<8xf32> to vector<8x1xf32>
    %225 = tpu.reciprocal %224 {approx = true} : vector<8x1xf32> -> vector<8x1xf32>
    %226 = vector.broadcast %225 : vector<8x1xf32> to vector<8x16xf32>
    %227 = arith.mulf %222, %226 : vector<8x16xf32>
    %228 = arith.truncf %227 : vector<8x16xf32> to vector<8x16xbf16>
    %229 = vector.extract_strided_slice %149 {offsets = [0, 16], sizes = [16, 8], strides = [1, 1]} : vector<16x128xf32> to vector<16x8xf32>
    %230 = arith.truncf %229 : vector<16x8xf32> to vector<16x8xbf16>
    %cst_78 = arith.constant dense<0.000000e+00> : vector<8x8xf32>
    %231 = tpu.matmul %228, %230, %cst_78 {dimension_numbers = #tpu.dot_dimension_numbers<[1], [0], [0], [1], [0, 0, 1, 1], [], []>} : vector<8x16xbf16>, vector<16x8xbf16>, vector<8x8xf32> -> vector<8x8xf32>
    %232 = arith.truncf %231 : vector<8x8xf32> to vector<8x8xbf16>
    %233 = vector.extract_strided_slice %12 {offsets = [16, 0], sizes = [8, 128], strides = [1, 1]} : vector<128x128xbf16> to vector<8x128xbf16>
    %cst_79 = arith.constant dense<0.000000e+00> : vector<8x128xf32>
    %234 = tpu.matmul %232, %233, %cst_79 {dimension_numbers = #tpu.dot_dimension_numbers<[1], [0], [0], [1], [0, 0, 1, 1], [], []>} : vector<8x8xbf16>, vector<8x128xbf16>, vector<8x128xf32> -> vector<8x128xf32>
    %235 = arith.addf %208, %234 : vector<8x128xf32>
    %236 = vector.extract_strided_slice %147 {offsets = [0, 24], sizes = [8, 8], strides = [1, 1]} : vector<8x128xf32> to vector<8x8xf32>
    %237 = arith.truncf %236 : vector<8x8xf32> to vector<8x8xbf16>
    %238 = vector.extract_strided_slice %148 {offsets = [0, 24], sizes = [16, 8], strides = [1, 1]} : vector<16x128xf32> to vector<16x8xf32>
    %239 = arith.truncf %238 : vector<16x8xf32> to vector<16x8xbf16>
    %cst_80 = arith.constant dense<0.000000e+00> : vector<8x16xf32>
    %240 = tpu.matmul %237, %239, %cst_80 {dimension_numbers = #tpu.dot_dimension_numbers<[1], [1], [0], [0], [0, 0, 1, 0], [], []>} : vector<8x8xbf16>, vector<16x8xbf16>, vector<8x16xf32> -> vector<8x16xf32>
    %cst_81 = arith.constant -1.000000e+09 : f32
    %241 = vector.shape_cast %153 : vector<1x16xi1> to vector<1x16xi1>
    %242 = vector.broadcast %241 : vector<1x16xi1> to vector<8x16xi1>
    %243 = vector.broadcast %cst_81 : f32 to vector<8x16xf32>
    %244 = arith.select %242, %240, %243 : vector<8x16xi1>, vector<8x16xf32>
    %cst_82 = arith.constant dense<0xFF800000> : vector<8xf32>
    %245 = vector.multi_reduction <maximumf>, %244, %cst_82 [1] : vector<8x16xf32> to vector<8xf32>
    %246 = vector.shape_cast %245 : vector<8xf32> to vector<8x1xf32>
    %247 = vector.broadcast %246 : vector<8x1xf32> to vector<8x16xf32>
    %248 = arith.subf %244, %247 : vector<8x16xf32>
    %249 = math.exp %248 : vector<8x16xf32>
    %cst_83 = arith.constant dense<0.000000e+00> : vector<8xf32>
    %250 = vector.multi_reduction <add>, %249, %cst_83 [1] : vector<8x16xf32> to vector<8xf32>
    %251 = vector.shape_cast %250 : vector<8xf32> to vector<8x1xf32>
    %252 = tpu.reciprocal %251 {approx = true} : vector<8x1xf32> -> vector<8x1xf32>
    %253 = vector.broadcast %252 : vector<8x1xf32> to vector<8x16xf32>
    %254 = arith.mulf %249, %253 : vector<8x16xf32>
    %255 = arith.truncf %254 : vector<8x16xf32> to vector<8x16xbf16>
    %256 = vector.extract_strided_slice %149 {offsets = [0, 24], sizes = [16, 8], strides = [1, 1]} : vector<16x128xf32> to vector<16x8xf32>
    %257 = arith.truncf %256 : vector<16x8xf32> to vector<16x8xbf16>
    %cst_84 = arith.constant dense<0.000000e+00> : vector<8x8xf32>
    %258 = tpu.matmul %255, %257, %cst_84 {dimension_numbers = #tpu.dot_dimension_numbers<[1], [0], [0], [1], [0, 0, 1, 1], [], []>} : vector<8x16xbf16>, vector<16x8xbf16>, vector<8x8xf32> -> vector<8x8xf32>
    %259 = arith.truncf %258 : vector<8x8xf32> to vector<8x8xbf16>
    %260 = vector.extract_strided_slice %12 {offsets = [24, 0], sizes = [8, 128], strides = [1, 1]} : vector<128x128xbf16> to vector<8x128xbf16>
    %cst_85 = arith.constant dense<0.000000e+00> : vector<8x128xf32>
    %261 = tpu.matmul %259, %260, %cst_85 {dimension_numbers = #tpu.dot_dimension_numbers<[1], [0], [0], [1], [0, 0, 1, 1], [], []>} : vector<8x8xbf16>, vector<8x128xbf16>, vector<8x128xf32> -> vector<8x128xf32>
    %262 = arith.addf %235, %261 : vector<8x128xf32>
    %263 = vector.broadcast %25 : vector<1x128xf32> to vector<8x128xf32>
    %264 = arith.addf %262, %263 : vector<8x128xf32>
    %c1_86 = arith.constant 1 : index
    %c0_87 = arith.constant 0 : index
    %c0_88 = arith.constant 0 : index
    %265 = vector.load %arg13[%c1_86, %c0_87, %c0_88] : memref<2x8x128xf32, #tpu.memory_space<vmem>>, vector<1x8x128xf32>
    %266 = vector.shape_cast %265 : vector<1x8x128xf32> to vector<8x128xf32>
    %267 = vector.shape_cast %264 : vector<8x128xf32> to vector<1x8x128xf32>
    tpu.vector_store %arg13[%c1_86, %c0_87, %c0_88], %267 {strides = array<i32>} : memref<2x8x128xf32, #tpu.memory_space<vmem>>, vector<1x8x128xf32>,
    return
  }
  func.func @transform_0(%arg0: i32) -> (i32, i32, i32) {
    %c0_i32 = arith.constant 0 : i32
    %c0_i32_0 = arith.constant 0 : i32
    %c0_i32_1 = arith.constant 0 : i32
    return %arg0, %c0_i32, %c0_i32_0 : i32, i32, i32
  }
  func.func @transform_1(%arg0: i32) -> (i32, i32, i32) {
    %c0_i32 = arith.constant 0 : i32
    %c0_i32_0 = arith.constant 0 : i32
    %c0_i32_1 = arith.constant 0 : i32
    return %arg0, %c0_i32, %c0_i32_0 : i32, i32, i32
  }
  func.func @transform_2(%arg0: i32) -> (i32, i32, i32) {
    %c0_i32 = arith.constant 0 : i32
    %c0_i32_0 = arith.constant 0 : i32
    %c0_i32_1 = arith.constant 0 : i32
    return %arg0, %c0_i32, %c0_i32_0 : i32, i32, i32
  }
  func.func @transform_3(%arg0: i32) -> (i32, i32, i32) {
    %c0_i32 = arith.constant 0 : i32
    %c0_i32_0 = arith.constant 0 : i32
    %c0_i32_1 = arith.constant 0 : i32
    return %arg0, %c0_i32, %c0_i32_0 : i32, i32, i32
  }
  func.func @transform_4(%arg0: i32) -> (i32, i32) {
    %c0_i32 = arith.constant 0 : i32
    %c0_i32_0 = arith.constant 0 : i32
    %c0_i32_1 = arith.constant 0 : i32
    return %c0_i32, %c0_i32_0 : i32, i32
  }
  func.func @transform_5(%arg0: i32) -> (i32, i32) {
    %c0_i32 = arith.constant 0 : i32
    %c0_i32_0 = arith.constant 0 : i32
    %c0_i32_1 = arith.constant 0 : i32
    return %c0_i32, %c0_i32_0 : i32, i32
  }
  func.func @transform_6(%arg0: i32) -> (i32, i32) {
    %c0_i32 = arith.constant 0 : i32
    %c0_i32_0 = arith.constant 0 : i32
    %c0_i32_1 = arith.constant 0 : i32
    return %c0_i32, %c0_i32_0 : i32, i32
  }
  func.func @transform_7(%arg0: i32) -> (i32, i32) {
    %c0_i32 = arith.constant 0 : i32
    %c0_i32_0 = arith.constant 0 : i32
    %c0_i32_1 = arith.constant 0 : i32
    return %c0_i32, %c0_i32_0 : i32, i32
  }
  func.func @transform_8(%arg0: i32) -> (i32, i32) {
    %c0_i32 = arith.constant 0 : i32
    %c0_i32_0 = arith.constant 0 : i32
    %c0_i32_1 = arith.constant 0 : i32
    return %c0_i32, %c0_i32_0 : i32, i32
  }
  func.func @transform_9(%arg0: i32) -> (i32, i32) {
    %c0_i32 = arith.constant 0 : i32
    %c0_i32_0 = arith.constant 0 : i32
    %c0_i32_1 = arith.constant 0 : i32
    return %c0_i32, %c0_i32_0 : i32, i32
  }
  func.func @transform_10(%arg0: i32) -> (i32, i32) {
    %c0_i32 = arith.constant 0 : i32
    %c0_i32_0 = arith.constant 0 : i32
    %c0_i32_1 = arith.constant 0 : i32
    return %c0_i32, %c0_i32_0 : i32, i32
  }
  func.func @transform_11(%arg0: i32) -> (i32, i32) {
    %c0_i32 = arith.constant 0 : i32
    %c0_i32_0 = arith.constant 0 : i32
    %c0_i32_1 = arith.constant 0 : i32
    return %c0_i32, %c0_i32_0 : i32, i32
  }
  func.func @transform_12(%arg0: i32) -> (i32, i32, i32) {
    %c0_i32 = arith.constant 0 : i32
    %c0_i32_0 = arith.constant 0 : i32
    %c0_i32_1 = arith.constant 0 : i32
    return %arg0, %c0_i32, %c0_i32_0 : i32, i32, i32
  }
}

</mosaic_0001>

<bundles_post_ra>
// kernel: tpu_custom_call.1
= control target key start
LH: loop header
LB: loop body
LE: loop exit
PB: predicated region body
PF: predicated region fallthrough
CT: control target
= control target key end

     0   :  { %17 = vsyncpa [#allocation3], 0  ;;  %s2781_s0 = inlined_call_operand.hbm [shape: f32[2,8,128], index: 0, kind: input, shape index: {}]   ;;  %s2782_s1 = inlined_call_operand.hbm [shape: f32[2,16,128], index: 1, kind: input, shape index: {}]   ;;  %s2783_s2 = inlined_call_operand.hbm [shape: f32[2,16,128], index: 2, kind: input, shape index: {}]   ;;  %s2784_s3 = inlined_call_operand.vmem [shape: f32[2,1,16], index: 3, kind: input, shape index: {}]   ;;  %s2785_s4 = inlined_call_operand.hbm [shape: bf16[128,128], index: 4, kind: input, shape index: {}]   ;;  %s2786_s5 = inlined_call_operand.vmem [shape: f32[1,128], index: 5, kind: input, shape index: {}]   ;;  %s2787_s6 = inlined_call_operand.hbm [shape: bf16[128,128], index: 6, kind: input, shape index: {}]   ;;  %s2788_s7 = inlined_call_operand.vmem [shape: f32[1,128], index: 7, kind: input, shape index: {}]   ;;  %s2789_s8 = inlined_call_operand.hbm [shape: bf16[128,128], index: 8, kind: input, shape index: {}]   ;;  %s2790_s9 = inlined_call_operand.vmem [shape: f32[1,128], index: 9, kind: input, shape index: {}]   ;;  %s2791_s10 = inlined_call_operand.hbm [shape: bf16[128,128], index: 10, kind: input, shape index: {}]   ;;  %s2792_s11 = inlined_call_operand.vmem [shape: f32[1,128], index: 11, kind: input, shape index: {}]   ;;  %s2793_s12 = inlined_call_operand.hbm [shape: f32[2,8,128], index: 12, kind: output, shape index: {}]  }
   0x1   :  { %18 = vsyncpa [#allocation6], 0 }
   0x2   :  { %19 = vsyncpa [#allocation9], 0 }
   0x3   :  { %20 = vsyncpa [#allocation12], 0 }
   0x4   :  { %21 = vsyncpa [#allocation4], 0  ;;  %s2377_s21 = smov [#allocation5]   ;;  %s2378_s23 = smov [#allocation8]  }
   0x5   :  { %s39_s22 = sshll.u32 %s2377_s21, 4  ;;  %s65_s24 = sshll.u32 %s2378_s23, 4  ;;  %s40_s22 = int_to_ptr.vmem [resolvable:$true] %s39_s22  ;;  %s66_s24 = int_to_ptr.vmem [resolvable:$true] %s65_s24 }
   0x6   :  { %s2215_s25 = scalar_lea.vmem %s40_s22, 512  ;;  %p2220_p1 = scmp.lt.s32.totalorder %s40_s22, %s40_s22 }
   0x7   :  { %p2216_p0 = scmp.ne.s32.totalorder %s40_s22, %s2215_s25  ;;  %p2221_p2 = scmp.lt.s32.totalorder %s2215_s25, %s2215_s25 }
   0x9   :  { %p2222_p3 = por %p2221_p2, %p2220_p1 }
   0xb   :  { %p2223_p4 = pnand %p2222_p3, %p2216_p0 }
   0xd   :  { %2226 = shalt.err (!%p2223_p4)
}
   0xe   :  { %s2379_s26 = smov 128   ;;  %s2380_s27 = smov 8  }
   0xf   :  { %45 = dma.hbm_to_vmem [thread:$0]  %s2782_s1, 512, %s40_s22, [#allocation6], %s2379_s26, %s2379_s26, %s2380_s27  }
  0x10   :  { %s2235_s30 = scalar_lea.vmem %s66_s24, 1024  ;;  %p2240_p6 = scmp.lt.s32.totalorder %s66_s24, %s66_s24 }
  0x11   :  { %p2236_p5 = scmp.ne.s32.totalorder %s66_s24, %s2235_s30  ;;  %p2241_p7 = scmp.lt.s32.totalorder %s2235_s30, %s2235_s30 }
  0x13   :  { %p2242_p8 = por %p2241_p7, %p2240_p6 }
  0x15   :  { %p2243_p9 = pnand %p2242_p8, %p2236_p5 }
  0x17   :  { %2246 = shalt.err (!%p2243_p9)
}
  0x18   :  { %s2381_s13 = smov 64   ;;  %s2382_s14 = smov 4  }
  0x19   :  { %71 = dma.hbm_to_vmem [thread:$0]  %s2785_s4, 1024, %s66_s24, [#allocation9], %s2381_s13, %s2381_s13, %s2382_s14  }
  0x1a   :  { %s2383_s17 = smov [#allocation11]   ;;  %s2384_s19 = smov [#allocation2]  }
  0x1b   :  { %s93_s18 = sshll.u32 %s2383_s17, 4  ;;  %s27_s1 = sshll.u32 %s2384_s19, 4  ;;  %s94_s18 = int_to_ptr.vmem [resolvable:$true] %s93_s18  ;;  %s28_s1 = int_to_ptr.vmem [resolvable:$true] %s27_s1 }
  0x1c   :  { %s2255_s20 = scalar_lea.vmem %s94_s18, 1024  ;;  %p2260_p11 = scmp.lt.s32.totalorder %s94_s18, %s94_s18 }
  0x1d   :  { %p2256_p10 = scmp.ne.s32.totalorder %s94_s18, %s2255_s20  ;;  %p2261_p12 = scmp.lt.s32.totalorder %s2255_s20, %s2255_s20 }
  0x1f   :  { %p2262_p13 = por %p2261_p12, %p2260_p11 }
  0x21   :  { %p2263_p0 = pnand %p2262_p13, %p2256_p10 }
  0x23   :  { %2266 = shalt.err (!%p2263_p0)
}
  0x24   :  { %99 = dma.hbm_to_vmem [thread:$0]  %s2789_s8, 1024, %s94_s18, [#allocation12], %s2381_s13, %s2381_s13, %s2382_s14  }
  0x25   :  { %s2275_s4 = scalar_lea.vmem %s28_s1, 256  ;;  %p2280_p2 = scmp.lt.s32.totalorder %s28_s1, %s28_s1 }
  0x26   :  { %p2276_p1 = scmp.ne.s32.totalorder %s28_s1, %s2275_s4  ;;  %p2281_p3 = scmp.lt.s32.totalorder %s2275_s4, %s2275_s4 }
  0x28   :  { %p2282_p4 = por %p2281_p3, %p2280_p2 }
  0x2a   :  { %p2283_p5 = pnand %p2282_p4, %p2276_p1 }
  0x2c   :  { %2286 = shalt.err (!%p2283_p5)
}
  0x2d   :  { %33 = dma.hbm_to_vmem [thread:$0]  %s2781_s0, 256, %s28_s1, [#allocation3], %s2379_s26, %s2379_s26, %s2380_s27  }
  0x2e   :  { %s2385_s25 = smov [#allocation7]   ;;  %s2386_s29 = smov [#allocation10]  }
  0x2f   :  { %s51_s28 = sshll.u32 %s2385_s25, 4  ;;  %s79_s30 = sshll.u32 %s2386_s29, 4  ;;  %s52_s28 = int_to_ptr.vmem [resolvable:$true] %s51_s28  ;;  %s80_s30 = int_to_ptr.vmem [resolvable:$true] %s79_s30 }
  0x30   :  { %s2295_s8 = scalar_lea.vmem %s52_s28, 512  ;;  %p2300_p7 = scmp.lt.s32.totalorder %s52_s28, %s52_s28 }
  0x31   :  { %p2296_p6 = scmp.ne.s32.totalorder %s52_s28, %s2295_s8  ;;  %p2301_p8 = scmp.lt.s32.totalorder %s2295_s8, %s2295_s8 }
  0x33   :  { %p2302_p9 = por %p2301_p8, %p2300_p7 }
  0x35   :  { %p2303_p10 = pnand %p2302_p9, %p2296_p6 }
  0x37   :  { %2306 = shalt.err (!%p2303_p10)
}
  0x38   :  { %57 = dma.hbm_to_vmem [thread:$0]  %s2783_s2, 512, %s52_s28, [#allocation6], %s2379_s26, %s2379_s26, %s2380_s27  }
  0x39   :  { %s2315_s0 = scalar_lea.vmem %s80_s30, 1024  ;;  %p2320_p12 = scmp.lt.s32.totalorder %s80_s30, %s80_s30 }
  0x3a   :  { %p2316_p11 = scmp.ne.s32.totalorder %s80_s30, %s2315_s0  ;;  %p2321_p13 = scmp.lt.s32.totalorder %s2315_s0, %s2315_s0 }
  0x3c   :  { %p2322_p0 = por %p2321_p13, %p2320_p12 }
  0x3e   :  { %p2323_p1 = pnand %p2322_p0, %p2316_p11 }
  0x40   :  { %2326 = shalt.err (!%p2323_p1)
}
  0x41   :  { %85 = dma.hbm_to_vmem [thread:$0]  %s2787_s6, 1024, %s80_s30, [#allocation9], %s2381_s13, %s2381_s13, %s2382_s14  }
  0x42   :  { %s2387_s19 = smov [#allocation13]  }
  0x43   :  { %s107_s1 = sshll.u32 %s2387_s19, 4  ;;  %s108_s1 = int_to_ptr.vmem [resolvable:$true] %s107_s1 }
  0x44   :  { %s2335_s20 = scalar_lea.vmem %s108_s1, 1024  ;;  %p2340_p3 = scmp.lt.s32.totalorder %s108_s1, %s108_s1 }
  0x45   :  { %p2336_p2 = scmp.ne.s32.totalorder %s108_s1, %s2335_s20  ;;  %p2341_p4 = scmp.lt.s32.totalorder %s2335_s20, %s2335_s20 }
  0x47   :  { %p2342_p5 = por %p2341_p4, %p2340_p3 }
  0x49   :  { %p2343_p6 = pnand %p2342_p5, %p2336_p2 }
  0x4b   :  { %2346 = shalt.err (!%p2343_p6)
}
  0x4c   :  { %113 = dma.hbm_to_vmem [thread:$0]  %s2791_s10, 1024, %s108_s1, [#allocation12], %s2381_s13, %s2381_s13, %s2382_s14  }
  0x4d   :  { %2367 = dma.done.wait [#allocation3], 256  }
  0x4e   :  { %2368 = vsyncadd [#allocation3], 4294967040 }
  0x4f   :  { %2369 = dma.done.wait [#allocation6], 1024  }
  0x50   :  { %2370 = vsyncadd [#allocation6], 4294966272 }
  0x51   :  { %2371 = dma.done.wait [#allocation9], 2048  }
  0x52   :  { %2372 = vsyncadd [#allocation9], 4294965248 }
  0x53   :  { %2373 = dma.done.wait [#allocation12], 2048  }
  0x54   :  { %2374 = vsyncadd [#allocation12], 4294965248  ;;  %v2388_v0 = vmov 0.0   ;;  %vm2389_vm0 = vmmov 0   ;;  %v2151_v1 = vld [vmem:[#allocation10 + $0x38] sm:$0xff]   ;;  %v2152_v2 = vld [vmem:[#allocation10 + $0x30] sm:$0xff]   ;;  %v562_v60 = vlaneseq }
  0x55   :  { %1929 = vmatprep.subr.bf16.mxu0 %v2388_v0  ;;  %1945 = vmatprep.mubr.msk.bf16.mxu0 %vm2389_vm0, %v2388_v0  ;;  %v2154_v3 = vld [vmem:[#allocation8 + $0x38] sm:$0xff]   ;;  %v2153_v4 = vld [vmem:[#allocation10 + $0x28] sm:$0xff]   ;;  %v2156_v5 = vld [vmem:[#allocation8 + $0x30] sm:$0xff]   ;;  %vm514_vm1 = vcmask 64512   ;;  %vm568_vm4 = vcmask 130048   ;;  %vm742_vm5 = vcmask 1043456  }
  0x56   :  { %1949 = vmatprep.subr.bf16.mxu1 %v2151_v1  ;;  %1930 = vmatpush3.bf16.msra.mxu0 %v2154_v3  ;;  %v2155_v6 = vld [vmem:[#allocation10 + $0x20] sm:$0xff]   ;;  %v2158_v7 = vld [vmem:[#allocation8 + $0x28] sm:$0xff]   ;;  %v2157_v8 = vld [vmem:[#allocation10 + $0x18] sm:$0xff]   ;;  %v2546_v62 = vshrl.u32 %v562_v60, 7  ;;  %s2393_s24 = smov 104  }
  0x57   :  { %1950 = vmatpush3.bf16.msra.mxu1 %v2151_v1  ;;  %1931 = vmatprep.subr.bf16.mxu0 %v2388_v0  ;;  %v2160_v9 = vld [vmem:[#allocation8 + $0x20] sm:$0xff]   ;;  %v142_v11 = vld [vmem:[#allocation5 + $0x8] sm:$0xff]  ;;  %v2159_v13 = vld [vmem:[#allocation10 + $0x10] sm:$0xff]   ;;  %v2391_v1 = vmov 0  }
  0x58   :  { %1951 = vmatprep.subr.bf16.mxu1 %v2152_v2  ;;  %v141_v10 = vld [vmem:[#allocation5] sm:$0xff]  ;;  %v2162_v14 = vld [vmem:[#allocation8 + $0x18] sm:$0xff]   ;;  %v2161_v15 = vld [vmem:[#allocation10 + $0x8] sm:$0xff]   ;;  %v564_v63 = vsub.s32 0, %v2546_v62 }
  0x59   :  { %v145_v12 = vpack.c.bf16 %v142_v11, %v141_v10  ;;  %v2164_v16 = vld [vmem:[#allocation8 + $0x10] sm:$0xff]   ;;  %v2163_v17 = vld [vmem:[#allocation10] sm:$0xff]   ;;  %v2165_v18 = vld [vmem:[#allocation8 + $0x8] sm:$0xff]  }
  0x5a   :  { %1932 = vmatpush3.bf16.msra.mxu0 %v2156_v5  ;;  %v143_v19 = vld [vmem:[#allocation5 + $0x10] sm:$0xff]  ;;  %v144_v20 = vld [vmem:[#allocation5 + $0x18] sm:$0xff]  ;;  %v2166_v21 = vld [vmem:[#allocation8] sm:$0xff]  }
  0x5b   :  { %1952 = vmatpush3.bf16.msra.mxu1 %v2152_v2  ;;  %1933 = vmatprep.subr.bf16.mxu0 %v2388_v0  ;;  %v138_v22 = vld [vmem:[#allocation2] sm:$0xff]  ;;  %v139_v23 = vld [vmem:[#allocation2 + $0x8] sm:$0xff]  ;;  %v146_v24 = vpack.c.bf16 %v144_v20, %v143_v19  ;;  %v147_v48 = vld [vmem:[#allocation7] sm:$0xff] }
  0x5c   :  { %1953 = vmatprep.subr.bf16.mxu1 %v2153_v4  ;;  %1965 = vmatprep.mubr.bf16.mxu1 %v145_v12  ;;  %v140_v25 = vpack.c.bf16 %v139_v23, %v138_v22  ;;  %v1808_v26 = vld [vmem:[%s2788_s7] ss:$0 sm:$0xff]  ;;  %s2390_s7 = smov 120   ;;  %v2167_v46 = vld [vmem:[#allocation11 + $0x38] sm:$0xff]   ;;  %v148_v49 = vld [vmem:[#allocation7 + $0x8] sm:$0xff] }
  0x5d   :  { %v1799_v32 = vld [vmem:[%s2786_s5] ss:$0 sm:$0xff]  ;;  %v2169_v50 = vld [vmem:[#allocation11 + $0x28] sm:$0xff]   ;;  %v151_v51 = vpack.c.bf16 %v148_v49, %v147_v48  ;;  %v2170_v52 = vld [vmem:[#allocation11 + $0x20] sm:$0xff]  }
  0x5e   :  { %1934 = vmatpush3.bf16.msra.mxu0 %v2158_v7  ;;  %v2168_v47 = vld [vmem:[#allocation11 + $0x30] sm:$0xff]   ;;  %v2171_v53 = vld [vmem:[#allocation11 + $0x18] sm:$0xff]   ;;  %v2173_v55 = vld [vmem:[#allocation11 + $0x8] sm:$0xff]  }
  0x5f   :  { %1954 = vmatpush3.bf16.msra.mxu1 %v2153_v4  ;;  %1935 = vmatprep.subr.bf16.mxu0 %v2388_v0  ;;  %v2172_v54 = vld [vmem:[#allocation11 + $0x10] sm:$0xff]   ;;  %v2174_v56 = vld [vmem:[#allocation11] sm:$0xff]   ;;  %v150_v58 = vld [vmem:[#allocation7 + $0x18] sm:$0xff] }
  0x60   :  { %1955 = vmatprep.subr.bf16.mxu1 %v2155_v6  ;;  %v149_v57 = vld [vmem:[#allocation7 + $0x10] sm:$0xff] }
  0x61   :  { %v152_v59 = vpack.c.bf16 %v150_v58, %v149_v57  ;;  %v510_v61 = vld [vmem:[%s2784_s3] sm:$0x1]  ;;  %v201_v57 = vld [vmem:[#allocation13] sm:$0xf] }
  0x62   :  { %1936 = vmatpush3.bf16.msra.mxu0 %v2160_v9  ;;  %vm511_vm2 = vcmp.gt.f32.partialorder %v510_v61, 0.0  ;;  %v1817_v11 = vld [vmem:[%s2790_s9] ss:$0 sm:$0xff]  ;;  %s2392_s9 = smov 112   ;;  %v2595_v60 = vsel %vm742_vm5, %v201_v57, 0 }
  0x63   :  { %1956 = vmatpush3.bf16.msra.mxu1 %v2155_v6  ;;  %1937 = vmatprep.subr.bf16.mxu0 %v2388_v0  ;;  %v561_v2 = vsel %vm511_vm2, 1, %v2391_v1 }
  0x64   :  { %1957 = vmatprep.subr.bf16.mxu1 %v2157_v8  ;;  %v2552_v3 = vrot.slane %v561_v2, %v564_v63 }
  0x66   :  { %1938 = vmatpush3.bf16.msra.mxu0 %v2162_v14  ;;  %vm566_vm3 = vcmp.eq.s32.totalorder %v2552_v3, 1 }
  0x67   :  { %1958 = vmatpush3.bf16.msra.mxu1 %v2157_v8  ;;  %1939 = vmatprep.subr.bf16.mxu0 %v2388_v0 }
  0x68   :  { %1959 = vmatprep.subr.bf16.mxu1 %v2159_v13 }
  0x6a   :  { %1940 = vmatpush3.bf16.msra.mxu0 %v2164_v16 }
  0x6b   :  { %1960 = vmatpush3.bf16.msra.mxu1 %v2159_v13  ;;  %1941 = vmatprep.subr.bf16.mxu0 %v2388_v0 }
  0x6c   :  { %1961 = vmatprep.subr.bf16.mxu1 %v2161_v15 }
  0x6e   :  { %1942 = vmatpush3.bf16.msra.mxu0 %v2165_v18 }
  0x6f   :  { %1962 = vmatpush3.bf16.msra.mxu1 %v2161_v15  ;;  %1943 = vmatprep.subr.bf16.mxu0 %v2388_v0 }
  0x70   :  { %1963 = vmatprep.subr.bf16.mxu1 %v2163_v17 }
  0x72   :  { %1944 = vmatpush3.bf16.msra.mxu0 %v2166_v21 }
  0x73   :  { %1964 = vmatpush3.bf16.msra.mxu1 %v2163_v17  ;;  %1969 = vmatprep.subr.bf16.mxu0 %v2167_v46 }
  0x74   :  { %1989 = vmatprep.subr.bf16.mxu1 %v2388_v0 }
  0x75   :  { %1946 = vmatmul.mubr.bf16.vlgmr.msra.gmra.mxu0 %v140_v25 }
  0x76   :  { %1966 = vmatmul.mubr.bf16.vlgmr.msra.gmra.mxu1 %v146_v24  ;;  %1970 = vmatpush3.bf16.msra.mxu0 %v2167_v46 }
  0x77   :  { %1991 = vmatprep.mubr.msk.bf16.mxu1 %vm2389_vm0, %v2388_v0  ;;  %1971 = vmatprep.subr.bf16.mxu0 %v2168_v47 }
  0x78   :  { %1985 = vmatprep.mubr.bf16.mxu0 %v151_v51 }
  0x7a   :  { %1972 = vmatpush3.bf16.msra.mxu0 %v2168_v47 }
  0x7b   :  { %1973 = vmatprep.subr.bf16.mxu0 %v2169_v50 }
  0x7e   :  { %1974 = vmatpush3.bf16.msra.mxu0 %v2169_v50 }
  0x7f   :  { %1975 = vmatprep.subr.bf16.mxu0 %v2170_v52 }
  0x82   :  { %1976 = vmatpush3.bf16.msra.mxu0 %v2170_v52 }
  0x83   :  { %1977 = vmatprep.subr.bf16.mxu0 %v2171_v53 }
  0x86   :  { %1978 = vmatpush3.bf16.msra.mxu0 %v2171_v53  ;;  %v202_v53 = vld [vmem:[#allocation13 + $0x4] sm:$0xf] }
  0x87   :  { %1979 = vmatprep.subr.bf16.mxu0 %v2172_v54 }
  0x8a   :  { %1980 = vmatpush3.bf16.msra.mxu0 %v2172_v54  ;;  %v2590_v54 = vsel %vm742_vm5, %v202_v53, 0 }
  0x8b   :  { %1981 = vmatprep.subr.bf16.mxu0 %v2173_v55 }
  0x8e   :  { %1982 = vmatpush3.bf16.msra.mxu0 %v2173_v55 }
  0x8f   :  { %1983 = vmatprep.subr.bf16.mxu0 %v2174_v56 }
  0x92   :  { %1984 = vmatpush3.bf16.msra.mxu0 %v2174_v56 }
  0x93   :  { %2013 = vmatprep.subr.bf16.mxu0 %v2388_v0 }
  0x95   :  { %1986 = vmatmul.mubr.bf16.vlgmr.msra.gmra.mxu0 %v152_v59 }
  0x96   :  { %2015 = vmatprep.mubr.msk.bf16.mxu0 %vm2389_vm0, %v2388_v0  ;;  %2014 = vmatpush3.bf16.msra.mxu0 %v2590_v54 }
  0x97   :  { %2025 = vmatprep.subr.bf16.mxu0 %v2388_v0 }
 0x135   :  { %v294_v30 = vpop.f32.mrf.mxu0 }
 0x136   :  { %v1967_v27 = vpop.f32.mrf.mxu1  ;;  %v295_v40 = vadd.f32 %v1799_v32, %v294_v30 }
 0x137   :  { %v399_v28 = vadd.f32 %v1967_v27, %v1808_v26  ;;  %v1947_v33 = vpop.f32.mrf.mxu0 }
 0x138   :  { %v390_v29 = vpop.f32.mrf.mxu1  ;;  %v2527_v44 = vpack.c.bf16 %v295_v40, %v295_v40 }
 0x139   :  { %v391_v35 = vadd.f32 %v1808_v26, %v390_v29  ;;  %v297_v37 = vpop.f32.mrf.mxu0 }
 0x13a   :  { %v1968_v31 = vpop.f32.mrf.mxu1  ;;  %v2523_v41 = vadd.f32 %v1799_v32, %v297_v37 }
 0x13b   :  { %v402_v34 = vadd.f32 %v1968_v31, %v1808_v26  ;;  %v1948_v42 = vpop.f32.mrf.mxu0 }
 0x13c   :  { %v393_v36 = vpop.f32.mrf.mxu1 }
 0x13d   :  { %v2521_v38 = vpack.c.bf16 %v402_v34, %v399_v28  ;;  %v394_v39 = vadd.f32 %v1808_v26, %v393_v36 }
 0x13f   :  { %v2525_v43 = vpack.c.bf16 %v394_v39, %v391_v35 }
 0x141   :  { %630 = vrot.lane.b32.xlu1 %v2525_v43, %s2390_s7  ;;  %v519_v45 = vsel %vm514_vm1, %v2525_v43, 0 }
 0x142   :  { %1990 = vmatpush3.bf16.xpose.msra.mxu1 %v519_v45 }
 0x143   :  { %1995 = vmatprep.subr.bf16.mxu1 %v2388_v0 }
 0x145   :  { %627 = vrot.lane.b32.xlu1 %v2527_v44, %s2390_s7 }
 0x149   :  { %1992 = vmatmul.mubr.msk.bf16.vlgmr.msra.gmra.mxu1 %vm514_vm1, %v2527_v44 }
 0x14a   :  { %1997 = vmatprep.mubr.msk.bf16.mxu1 %vm2389_vm0, %v2388_v0 }
 0x155   :  { %v1987_v10 = vpop.f32.mrf.mxu0 }
 0x156   :  { %v503_v13 = vadd.f32 %v1987_v10, %v1817_v11 }
 0x157   :  { %v494_v12 = vpop.f32.mrf.mxu0 }
 0x158   :  { %v495_v22 = vadd.f32 %v1817_v11, %v494_v12 }
 0x159   :  { %v1988_v14 = vpop.f32.mrf.mxu0 }
 0x15a   :  { %v506_v15 = vadd.f32 %v1988_v14, %v1817_v11 }
 0x15b   :  { %v497_v23 = vpop.f32.mrf.mxu0 }
 0x15c   :  { %v2561_v16 = vpack.c.bf16 %v506_v15, %v503_v13  ;;  %v498_v24 = vadd.f32 %v1817_v11, %v497_v23 }
 0x15e   :  { %v2564_v25 = vpack.c.bf16 %v498_v24, %v495_v22 }
 0x160   :  { %1996 = vmatpush3.bf16.msra.mxu1 %v2564_v25 }
 0x161   :  { %2001 = vmatprep.subr.bf16.mxu1 %v2388_v0 }
 0x1b3   :  { %v631_v29 = vpop.permute.xlu1 %630 }
 0x1b4   :  { %v636_v31 = vsel %vm514_vm1, %v631_v29, 0 }
 0x1b7   :  { %v628_v32 = vpop.permute.xlu1 %627 }
 0x209   :  { %v555_v4 = vpop.f32.mrf.mxu1 }
 0x20a   :  { %v567_v5 = vsel %vm566_vm3, %v555_v4, -1e+09 }
 0x20b   :  { %v1993_v6 = vpop.f32.mrf.mxu1  ;;  %v569_v7 = vsel %vm568_vm4, %v567_v5, -inf }
 0x20c   :  { %570 = vmax.xlane.f32.xlu0 %v569_v7 }
 0x20d   :  { %v558_v8 = vpop.f32.mrf.mxu1 }
 0x20f   :  { %v1994_v9 = vpop.f32.mrf.mxu1 }
 0x295   :  { %v571_v17 = vpop.xlane.xlu0 %570 }
 0x296   :  { %v572_v18 = vsub.f32 %v567_v5, %v571_v17 }
 0x298   :  { %v573_v19 = vmul.f32 1.442695, %v572_v18 }
 0x29a   :  { %2175 = vpow2.f32 %v573_v19 }
 0x2a7   :  { %v2176_v20 = vpop.eup %2175 }
 0x2a8   :  { %v575_v21 = vsel %vm568_vm4, %v2176_v20, 0.0 }
 0x2a9   :  { %576 = vadd.xlane.f32.xlu0 %v575_v21 }
 0x332   :  { %v577_v26 = vpop.xlane.xlu0 %576 }
 0x333   :  { %2177 = vrcp.f32 %v577_v26 }
 0x340   :  { %v2178_v27 = vpop.eup %2177 }
 0x341   :  { %v579_v28 = vmul.f32 %v2178_v27, %v2176_v20 }
 0x343   :  { %v580_v30 = vpack.c.bf16 %v579_v28, %v579_v28 }
 0x345   :  { %1998 = vmatmul.mubr.msk.bf16.vlgmr.msra.gmra.mxu1 %vm568_vm4, %v580_v30 }
 0x346   :  { %2002 = vmatpush3.bf16.xpose.msra.mxu1 %v636_v31  ;;  %2003 = vmatprep.mubr.msk.bf16.mxu1 %vm2389_vm0, %v2388_v0 }
 0x347   :  { %2007 = vmatprep.subr.bf16.mxu1 %v2388_v0 }
 0x34d   :  { %2004 = vmatmul.mubr.msk.bf16.vlgmr.msra.gmra.mxu1 %vm514_vm1, %v628_v32 }
 0x34e   :  { %2009 = vmatprep.mubr.msk.bf16.mxu1 %vm2389_vm0, %v2388_v0 }
 0x405   :  { %v619_v33 = vpop.f32.mrf.mxu1 }
 0x406   :  { %v625_v61 = vpack.c.bf16 %v619_v33, %v619_v33 }
 0x407   :  { %v1999_v34 = vpop.f32.mrf.mxu1 }
 0x409   :  { %v622_v35 = vpop.f32.mrf.mxu1 }
 0x40b   :  { %v2000_v36 = vpop.f32.mrf.mxu1 }
 0x40d   :  { %v672_v37 = vpop.f32.mrf.mxu1 }
 0x40e   :  { %v678_v39 = vsel %vm566_vm3, %v672_v37, -1e+09 }
 0x40f   :  { %v2005_v40 = vpop.f32.mrf.mxu1  ;;  %v679_v42 = vsel %vm568_vm4, %v678_v39, -inf }
 0x410   :  { %680 = vmax.xlane.f32.xlu0 %v679_v42 }
 0x411   :  { %v675_v45 = vpop.f32.mrf.mxu1 }
 0x413   :  { %v2006_v46 = vpop.f32.mrf.mxu1 }
 0x426   :  { %692 = vrot.lane.b32.xlu0 %v2564_v25, %s2390_s7 }
 0x42a   :  { %834 = vrot.lane.b32.xlu0 %v2525_v43, %s2392_s9 }
 0x42e   :  { %832 = vrot.lane.b32.xlu0 %v2527_v44, %s2392_s9 }
 0x499   :  { %v681_v47 = vpop.xlane.xlu0 %680 }
 0x49a   :  { %v682_v48 = vsub.f32 %v678_v39, %v681_v47 }
 0x49c   :  { %v683_v49 = vmul.f32 1.442695, %v682_v48 }
 0x49d   :  { %v693_v50 = vpop.permute.xlu0 %692 }
 0x49e   :  { %2179 = vpow2.f32 %v683_v49  ;;  %2008 = vmatpush3.bf16.msra.mxu1 %v693_v50 }
 0x49f   :  { %2019 = vmatprep.subr.bf16.mxu1 %v2388_v0 }
 0x4a1   :  { %v835_v4 = vpop.permute.xlu0 %834 }
 0x4a2   :  { %v840_v8 = vsel %vm514_vm1, %v835_v4, 0 }
 0x4a5   :  { %v833_v12 = vpop.permute.xlu0 %832 }
 0x4ab   :  { %v2180_v51 = vpop.eup %2179 }
 0x4ac   :  { %v685_v52 = vsel %vm568_vm4, %v2180_v51, 0.0 }
 0x4ad   :  { %686 = vadd.xlane.f32.xlu1 %v685_v52 }
 0x4be   :  { %895 = vrot.lane.b32.xlu1 %v2564_v25, %s2392_s9 }
 0x536   :  { %v687_v55 = vpop.xlane.xlu1 %686 }
 0x537   :  { %2181 = vrcp.f32 %v687_v55 }
 0x53a   :  { %v896_v2 = vpop.permute.xlu1 %895 }
 0x544   :  { %v2182_v56 = vpop.eup %2181 }
 0x545   :  { %v689_v58 = vmul.f32 %v2182_v56, %v2180_v51  ;;  %v2651_v56 = vpack.c.bf16 %v2523_v41, %v2523_v41 }
 0x547   :  { %v690_v59 = vpack.c.bf16 %v689_v58, %v689_v58 }
 0x549   :  { %2010 = vmatmul.mubr.msk.bf16.vlgmr.msra.gmra.mxu1 %vm568_vm4, %v690_v59 }
 0x54a   :  { %2020 = vmatpush3.bf16.msra.mxu1 %v2595_v60  ;;  %2021 = vmatprep.mubr.msk.bf16.mxu1 %vm2389_vm0, %v2388_v0 }
 0x54b   :  { %2031 = vmatprep.subr.bf16.mxu1 %v2388_v0 }
 0x551   :  { %2022 = vmatmul.mubr.msk.bf16.vlgmr.msra.gmra.mxu1 %vm514_vm1, %v625_v61 }
 0x552   :  { %2032 = vmatpush3.bf16.msra.mxu1 %v896_v2  ;;  %2033 = vmatprep.mubr.msk.bf16.mxu1 %vm2389_vm0, %v2388_v0 }
 0x553   :  { %2043 = vmatprep.subr.bf16.mxu1 %v2388_v0 }
 0x609   :  { %v732_v5 = vpop.f32.mrf.mxu1 }
 0x60a   :  { %v738_v6 = vpack.c.bf16 %v732_v5, %v732_v5 }
 0x60b   :  { %v2011_v7 = vpop.f32.mrf.mxu1 }
 0x60c   :  { %2016 = vmatmul.mubr.msk.bf16.vlgmr.msra.gmra.mxu0 %vm514_vm1, %v738_v6 }
 0x60d   :  { %2026 = vmatpush3.bf16.xpose.msra.mxu0 %v840_v8  ;;  %v735_v9 = vpop.f32.mrf.mxu1  ;;  %2027 = vmatprep.mubr.msk.bf16.mxu0 %vm2389_vm0, %v2388_v0  ;;  %v204_v8 = vld [vmem:[#allocation13 + $0xc] sm:$0xf] }
 0x60e   :  { %2037 = vmatprep.subr.bf16.mxu0 %v2388_v0  ;;  %v2662_v9 = vsel %vm742_vm5, %v204_v8, 0 }
 0x60f   :  { %v2012_v10 = vpop.f32.mrf.mxu1 }
 0x611   :  { %v2611_v11 = vpop.f32.mrf.mxu1 }
 0x613   :  { %v2023_v13 = vpop.f32.mrf.mxu1 }
 0x614   :  { %2028 = vmatmul.mubr.msk.bf16.vlgmr.msra.gmra.mxu0 %vm514_vm1, %v833_v12 }
 0x615   :  { %v829_v14 = vpop.f32.mrf.mxu1  ;;  %2039 = vmatprep.mubr.msk.bf16.mxu0 %vm2389_vm0, %v2388_v0 }
 0x617   :  { %v2024_v15 = vpop.f32.mrf.mxu1 }
 0x6cc   :  { %v2616_v17 = vpop.f32.mrf.mxu0 }
 0x6cd   :  { %v827_v2 = vadd.f32 %v2611_v11, %v2616_v17  ;;  %v1163_v11 = vsel %vm514_vm1, %v2521_v38, 0 }
 0x6ce   :  { %v2017_v18 = vpop.f32.mrf.mxu0 }
 0x6d0   :  { %v783_v19 = vpop.f32.mrf.mxu0 }
 0x6d1   :  { %v1839_v19 = vld [vmem:[%s2784_s3 + $0x1] sm:$0x1] }
 0x6d2   :  { %v2018_v20 = vpop.f32.mrf.mxu0  ;;  %vm1156_vm6 = vcmp.gt.f32.partialorder %v1839_v19, 0.0 }
 0x6d3   :  { %v1205_v20 = vsel %vm1156_vm6, 1, %v2391_v1 }
 0x6d4   :  { %v876_v21 = vpop.f32.mrf.mxu0 }
 0x6d5   :  { %v882_v22 = vsel %vm566_vm3, %v876_v21, -1e+09 }
 0x6d6   :  { %v2029_v23 = vpop.f32.mrf.mxu0  ;;  %v883_v24 = vsel %vm568_vm4, %v882_v22, -inf }
 0x6d7   :  { %884 = vmax.xlane.f32.xlu0 %v883_v24  ;;  %v2689_v24 = vrot.slane %v1205_v20, %v564_v63 }
 0x6d8   :  { %v879_v26 = vpop.f32.mrf.mxu0 }
 0x6d9   :  { %vm1210_vm7 = vcmp.eq.s32.totalorder %v2689_v24, 1 }
 0x6da   :  { %v2030_v27 = vpop.f32.mrf.mxu0 }
 0x760   :  { %v885_v28 = vpop.xlane.xlu0 %884 }
 0x761   :  { %v886_v29 = vsub.f32 %v882_v22, %v885_v28 }
 0x763   :  { %v887_v30 = vmul.f32 1.442695, %v886_v29 }
 0x765   :  { %2183 = vpow2.f32 %v887_v30 }
 0x772   :  { %v2184_v31 = vpop.eup %2183 }
 0x773   :  { %v889_v32 = vsel %vm568_vm4, %v2184_v31, 0.0 }
 0x774   :  { %890 = vadd.xlane.f32.xlu1 %v889_v32 }
 0x785   :  { %991 = vrot.lane.b32.xlu1 %v2525_v43, %s2393_s24 }
 0x789   :  { %989 = vrot.lane.b32.xlu1 %v2527_v44, %s2393_s24  ;;  %v203_v44 = vld [vmem:[#allocation13 + $0x8] sm:$0xf] }
 0x78a   :  { %v2635_v40 = vsel %vm742_vm5, %v203_v44, 0 }
 0x78b   :  { %2038 = vmatpush3.bf16.msra.mxu0 %v2635_v40 }
 0x78c   :  { %2049 = vmatprep.subr.bf16.mxu0 %v2388_v0 }
 0x7fd   :  { %v891_v33 = vpop.xlane.xlu1 %890 }
 0x7fe   :  { %2185 = vrcp.f32 %v891_v33 }
 0x801   :  { %v992_v36 = vpop.permute.xlu1 %991 }
 0x802   :  { %v997_v39 = vsel %vm514_vm1, %v992_v36, 0 }
 0x805   :  { %v990_v43 = vpop.permute.xlu1 %989 }
 0x80b   :  { %v2186_v34 = vpop.eup %2185 }
 0x80c   :  { %v893_v35 = vmul.f32 %v2186_v34, %v2184_v31 }
 0x80e   :  { %v894_v37 = vpack.c.bf16 %v893_v35, %v893_v35 }
 0x810   :  { %2034 = vmatmul.mubr.msk.bf16.vlgmr.msra.gmra.mxu1 %vm568_vm4, %v894_v37 }
 0x811   :  { %2044 = vmatpush3.bf16.xpose.msra.mxu1 %v997_v39  ;;  %2045 = vmatprep.mubr.msk.bf16.mxu1 %vm2389_vm0, %v2388_v0 }
 0x812   :  { %2055 = vmatprep.subr.bf16.mxu1 %v2388_v0 }
 0x818   :  { %2046 = vmatmul.mubr.msk.bf16.vlgmr.msra.gmra.mxu1 %vm514_vm1, %v990_v43 }
 0x819   :  { %2057 = vmatprep.mubr.msk.bf16.mxu1 %vm2389_vm0, %v2388_v0  ;;  %2056 = vmatpush3.bf16.msra.mxu1 %v2662_v9 }
 0x81a   :  { %2067 = vmatprep.subr.bf16.mxu1 %v2388_v0 }
 0x8d0   :  { %v935_v42 = vpop.f32.mrf.mxu1 }
 0x8d1   :  { %v941_v45 = vpack.c.bf16 %v935_v42, %v935_v42 }
 0x8d2   :  { %v2035_v46 = vpop.f32.mrf.mxu1 }
 0x8d3   :  { %2040 = vmatmul.mubr.msk.bf16.vlgmr.msra.gmra.mxu0 %vm514_vm1, %v941_v45 }
 0x8d4   :  { %v938_v47 = vpop.f32.mrf.mxu1  ;;  %2051 = vmatprep.mubr.msk.bf16.mxu0 %vm2389_vm0, %v2388_v0 }
 0x8d6   :  { %v2036_v48 = vpop.f32.mrf.mxu1 }
 0x8d8   :  { %v1033_v49 = vpop.f32.mrf.mxu1 }
 0x8d9   :  { %v1039_v50 = vsel %vm566_vm3, %v1033_v49, -1e+09  ;;  %v2712_v49 = vld [vmem:[%s2792_s11] ss:$0 sm:$0xff]  ;;  %s2394_s11 = smov [#allocation14]  }
 0x8da   :  { %v2047_v51 = vpop.f32.mrf.mxu1  ;;  %v1040_v52 = vsel %vm568_vm4, %v1039_v50, -inf  ;;  %s1784_s30 = sshll.u32 %s2394_s11, 4  ;;  %s1785_s30 = int_to_ptr.vmem [resolvable:$true] %s1784_s30 }
 0x8db   :  { %1041 = vmax.xlane.f32.xlu0 %v1040_v52  ;;  %s2347_s8 = scalar_lea.vmem %s1785_s30, 256  ;;  %p2352_p8 = scmp.lt.s32.totalorder %s1785_s30, %s1785_s30 }
 0x8dc   :  { %v1036_v53 = vpop.f32.mrf.mxu1  ;;  %p2348_p7 = scmp.ne.s32.totalorder %s1785_s30, %s2347_s8  ;;  %p2353_p9 = scmp.lt.s32.totalorder %s2347_s8, %s2347_s8 }
 0x8de   :  { %v2048_v55 = vpop.f32.mrf.mxu1  ;;  %p2354_p10 = por %p2353_p9, %p2352_p8 }
 0x8e0   :  { %p2355_p11 = pnand %p2354_p10, %p2348_p7 }
 0x8f1   :  { %1052 = vrot.lane.b32.xlu0 %v2564_v25, %s2393_s24 }
 0x8f5   :  { %1273 = vrot.lane.b32.xlu0 %v2521_v38, %s2390_s7 }
 0x8f9   :  { %1270 = vrot.lane.b32.xlu0 %v2651_v56, %s2390_s7 }
 0x964   :  { %v1042_v3 = vpop.xlane.xlu0 %1041 }
 0x965   :  { %v1043_v57 = vsub.f32 %v1039_v50, %v1042_v3 }
 0x967   :  { %v1044_v58 = vmul.f32 1.442695, %v1043_v57 }
 0x968   :  { %v1053_v59 = vpop.permute.xlu0 %1052 }
 0x969   :  { %2187 = vpow2.f32 %v1044_v58  ;;  %2050 = vmatpush3.bf16.msra.mxu0 %v1053_v59 }
 0x96a   :  { %2061 = vmatprep.subr.bf16.mxu0 %v2388_v0 }
 0x96c   :  { %v1274_v15 = vpop.permute.xlu0 %1273 }
 0x96d   :  { %v1279_v17 = vsel %vm514_vm1, %v1274_v15, 0 }
 0x970   :  { %v1271_v18 = vpop.permute.xlu0 %1270 }
 0x976   :  { %v2188_v61 = vpop.eup %2187 }
 0x977   :  { %v1046_v25 = vsel %vm568_vm4, %v2188_v61, 0.0 }
 0x978   :  { %1047 = vadd.xlane.f32.xlu1 %v1046_v25 }
 0x993   :  { %v982_v41 = vpop.f32.mrf.mxu0 }
 0x994   :  { %v2659_v4 = vadd.f32 %v982_v41, %v827_v2 }
 0x995   :  { %v2041_v5 = vpop.f32.mrf.mxu0 }
 0x997   :  { %v985_v6 = vpop.f32.mrf.mxu0 }
 0x999   :  { %v2042_v7 = vpop.f32.mrf.mxu0 }
 0xa01   :  { %v1048_v10 = vpop.xlane.xlu1 %1047 }
 0xa02   :  { %2189 = vrcp.f32 %v1048_v10 }
 0xa0f   :  { %v2190_v12 = vpop.eup %2189 }
 0xa10   :  { %v1050_v13 = vmul.f32 %v2190_v12, %v2188_v61 }
 0xa12   :  { %v1051_v14 = vpack.c.bf16 %v1050_v13, %v1050_v13 }
 0xa14   :  { %2052 = vmatmul.mubr.msk.bf16.vlgmr.msra.gmra.mxu0 %vm568_vm4, %v1051_v14 }
 0xa15   :  { %2062 = vmatpush3.bf16.xpose.msra.mxu0 %v1163_v11  ;;  %2063 = vmatprep.mubr.msk.bf16.mxu0 %vm2389_vm0, %v2388_v0 }
 0xa16   :  { %2073 = vmatprep.subr.bf16.mxu0 %v2388_v0 }
 0xa1c   :  { %2064 = vmatmul.mubr.msk.bf16.vlgmr.msra.gmra.mxu0 %vm514_vm1, %v2651_v56 }
 0xa1d   :  { %2074 = vmatpush3.bf16.xpose.msra.mxu0 %v1279_v17  ;;  %2075 = vmatprep.mubr.msk.bf16.mxu0 %vm2389_vm0, %v2388_v0 }
 0xa1e   :  { %2085 = vmatprep.subr.bf16.mxu0 %v2388_v0 }
 0xa24   :  { %2076 = vmatmul.mubr.msk.bf16.vlgmr.msra.gmra.mxu0 %vm514_vm1, %v1271_v18 }
 0xa25   :  { %2086 = vmatpush3.bf16.msra.mxu0 %v2590_v54  ;;  %2087 = vmatprep.mubr.msk.bf16.mxu0 %vm2389_vm0, %v2388_v0 }
 0xa26   :  { %2097 = vmatprep.subr.bf16.mxu0 %v2388_v0 }
 0xad4   :  { %v1092_v21 = vpop.f32.mrf.mxu0 }
 0xad5   :  { %v1098_v22 = vpack.c.bf16 %v1092_v21, %v1092_v21 }
 0xad6   :  { %v2053_v23 = vpop.f32.mrf.mxu0 }
 0xad7   :  { %2058 = vmatmul.mubr.msk.bf16.vlgmr.msra.gmra.mxu1 %vm514_vm1, %v1098_v22 }
 0xad8   :  { %2068 = vmatpush3.bf16.msra.mxu1 %v2561_v16  ;;  %v1095_v54 = vpop.f32.mrf.mxu0  ;;  %2069 = vmatprep.mubr.msk.bf16.mxu1 %vm2389_vm0, %v2388_v0 }
 0xad9   :  { %2079 = vmatprep.subr.bf16.mxu1 %v2388_v0 }
 0xada   :  { %v2054_v26 = vpop.f32.mrf.mxu0 }
 0xadc   :  { %v1199_v1 = vpop.f32.mrf.mxu0 }
 0xadd   :  { %v1211_v27 = vsel %vm1210_vm7, %v1199_v1, -1e+09 }
 0xade   :  { %v2065_v62 = vpop.f32.mrf.mxu0  ;;  %v1212_v63 = vsel %vm568_vm4, %v1211_v27, -inf }
 0xadf   :  { %1213 = vmax.xlane.f32.xlu0 %v1212_v63 }
 0xae0   :  { %v1202_v28 = vpop.f32.mrf.mxu0 }
 0xae2   :  { %v2066_v29 = vpop.f32.mrf.mxu0 }
 0xae4   :  { %v1315_v30 = vpop.f32.mrf.mxu0 }
 0xae5   :  { %v1321_v31 = vsel %vm1210_vm7, %v1315_v30, -1e+09 }
 0xae6   :  { %v2077_v32 = vpop.f32.mrf.mxu0  ;;  %v1322_v33 = vsel %vm568_vm4, %v1321_v31, -inf }
 0xae7   :  { %1323 = vmax.xlane.f32.xlu1 %v1322_v33 }
 0xae8   :  { %v1318_v34 = vpop.f32.mrf.mxu0 }
 0xaea   :  { %v2078_v35 = vpop.f32.mrf.mxu0 }
 0xaf5   :  { %1470 = vrot.lane.b32.xlu0 %v2521_v38, %s2392_s9 }
 0xb68   :  { %v1214_v36 = vpop.xlane.xlu0 %1213 }
 0xb69   :  { %v1215_v37 = vsub.f32 %v1211_v27, %v1214_v36 }
 0xb6b   :  { %v1216_v39 = vmul.f32 1.442695, %v1215_v37 }
 0xb6c   :  { %v1471_v13 = vpop.permute.xlu0 %1470 }
 0xb6d   :  { %2191 = vpow2.f32 %v1216_v39 }
 0xb70   :  { %v1324_v43 = vpop.xlane.xlu1 %1323 }
 0xb71   :  { %v1325_v44 = vsub.f32 %v1321_v31, %v1324_v43 }
 0xb73   :  { %v1326_v42 = vmul.f32 1.442695, %v1325_v44 }
 0xb75   :  { %2193 = vpow2.f32 %v1326_v42 }
 0xb7a   :  { %v2192_v45 = vpop.eup %2191 }
 0xb7b   :  { %v1218_v46 = vsel %vm568_vm4, %v2192_v45, 0.0 }
 0xb7c   :  { %1219 = vadd.xlane.f32.xlu1 %v1218_v46 }
 0xb82   :  { %v2194_v47 = vpop.eup %2193 }
 0xb83   :  { %v1328_v48 = vsel %vm568_vm4, %v2194_v47, 0.0 }
 0xb84   :  { %1329 = vadd.xlane.f32.xlu1 %v1328_v48 }
 0xb95   :  { %1335 = vrot.lane.b32.xlu1 %v2561_v16, %s2390_s7 }
 0xb97   :  { %v1139_v50 = vpop.f32.mrf.mxu1 }
 0xb98   :  { %v1145_v51 = vadd.f32 %v1139_v50, %v2659_v4 }
 0xb99   :  { %1468 = vrot.lane.b32.xlu1 %v2651_v56, %s2392_s9  ;;  %v2059_v52 = vpop.f32.mrf.mxu1 }
 0xb9a   :  { %v1152_v53 = vadd.f32 %v2712_v49, %v1145_v51 }
 0xb9b   :  { %v1142_v55 = vpop.f32.mrf.mxu1 }
 0xb9c   :  { %1153 = vst [vmem:[#allocation14] sm:$0xff] %v1152_v53 }
 0xb9d   :  { %v2060_v3 = vpop.f32.mrf.mxu1 }
 0xc05   :  { %v1220_v57 = vpop.xlane.xlu1 %1219 }
 0xc06   :  { %2195 = vrcp.f32 %v1220_v57 }
 0xc0d   :  { %v1330_v58 = vpop.xlane.xlu1 %1329 }
 0xc0e   :  { %2197 = vrcp.f32 %v1330_v58 }
 0xc11   :  { %v1336_v2 = vpop.permute.xlu1 %1335 }
 0xc13   :  { %v2196_v59 = vpop.eup %2195 }
 0xc14   :  { %v1222_v61 = vmul.f32 %v2196_v59, %v2192_v45 }
 0xc15   :  { %v1469_v19 = vpop.permute.xlu1 %1468 }
 0xc16   :  { %v1223_v25 = vpack.c.bf16 %v1222_v61, %v1222_v61 }
 0xc18   :  { %2070 = vmatmul.mubr.msk.bf16.vlgmr.msra.gmra.mxu1 %vm568_vm4, %v1223_v25 }
 0xc19   :  { %2080 = vmatpush3.bf16.msra.mxu1 %v1336_v2  ;;  %2081 = vmatprep.mubr.msk.bf16.mxu1 %vm2389_vm0, %v2388_v0 }
 0xc1a   :  { %2091 = vmatprep.subr.bf16.mxu1 %v2388_v0 }
 0xc1b   :  { %v2198_v41 = vpop.eup %2197 }
 0xc1c   :  { %v1332_v4 = vmul.f32 %v2198_v41, %v2194_v47 }
 0xc1e   :  { %v1333_v5 = vpack.c.bf16 %v1332_v4, %v1332_v4 }
 0xc20   :  { %2082 = vmatmul.mubr.msk.bf16.vlgmr.msra.gmra.mxu1 %vm568_vm4, %v1333_v5 }
 0xc21   :  { %2092 = vmatpush3.bf16.msra.mxu1 %v2595_v60  ;;  %2093 = vmatprep.mubr.msk.bf16.mxu1 %vm2389_vm0, %v2388_v0  ;;  %v1476_v60 = vsel %vm514_vm1, %v1471_v13, 0 }
 0xc22   :  { %2103 = vmatprep.subr.bf16.mxu1 %v2388_v0 }
 0xcd8   :  { %v1262_v6 = vpop.f32.mrf.mxu1 }
 0xcd9   :  { %v1268_v7 = vpack.c.bf16 %v1262_v6, %v1262_v6 }
 0xcda   :  { %v2071_v8 = vpop.f32.mrf.mxu1 }
 0xcdb   :  { %2094 = vmatmul.mubr.msk.bf16.vlgmr.msra.gmra.mxu1 %vm514_vm1, %v1268_v7 }
 0xcdc   :  { %v1265_v10 = vpop.f32.mrf.mxu1  ;;  %2105 = vmatprep.mubr.msk.bf16.mxu1 %vm2389_vm0, %v2388_v0 }
 0xcde   :  { %v2072_v12 = vpop.f32.mrf.mxu1 }
 0xce0   :  { %v1375_v14 = vpop.f32.mrf.mxu1 }
 0xce1   :  { %v1381_v11 = vpack.c.bf16 %v1375_v14, %v1375_v14 }
 0xce2   :  { %v2083_v15 = vpop.f32.mrf.mxu1 }
 0xce3   :  { %2088 = vmatmul.mubr.msk.bf16.vlgmr.msra.gmra.mxu0 %vm514_vm1, %v1381_v11 }
 0xce4   :  { %2098 = vmatpush3.bf16.xpose.msra.mxu0 %v1476_v60  ;;  %v1378_v17 = vpop.f32.mrf.mxu1  ;;  %2099 = vmatprep.mubr.msk.bf16.mxu0 %vm2389_vm0, %v2388_v0 }
 0xce5   :  { %2109 = vmatprep.subr.bf16.mxu0 %v2388_v0 }
 0xce6   :  { %v2084_v18 = vpop.f32.mrf.mxu1 }
 0xceb   :  { %2100 = vmatmul.mubr.msk.bf16.vlgmr.msra.gmra.mxu0 %vm514_vm1, %v1469_v19 }
 0xcec   :  { %2110 = vmatpush3.bf16.msra.mxu0 %v2635_v40  ;;  %2111 = vmatprep.mubr.msk.bf16.mxu0 %vm2389_vm0, %v2388_v0 }
 0xced   :  { %2121 = vmatprep.subr.bf16.mxu0 %v2388_v0 }
 0xd9b   :  { %v1462_v20 = vpop.f32.mrf.mxu1 }
 0xd9d   :  { %v2095_v21 = vpop.f32.mrf.mxu1 }
 0xd9f   :  { %v1465_v22 = vpop.f32.mrf.mxu1 }
 0xda1   :  { %v2096_v23 = vpop.f32.mrf.mxu1 }
 0xda3   :  { %v1419_v54 = vpop.f32.mrf.mxu0 }
 0xda4   :  { %v2740_v26 = vadd.f32 %v1462_v20, %v1419_v54 }
 0xda5   :  { %v2089_v1 = vpop.f32.mrf.mxu0 }
 0xda7   :  { %v1422_v27 = vpop.f32.mrf.mxu0 }
 0xda9   :  { %v2090_v62 = vpop.f32.mrf.mxu0 }
 0xdab   :  { %v1512_v63 = vpop.f32.mrf.mxu0 }
 0xdac   :  { %v1518_v28 = vsel %vm1210_vm7, %v1512_v63, -1e+09 }
 0xdad   :  { %v2101_v40 = vpop.f32.mrf.mxu0  ;;  %v1519_v29 = vsel %vm568_vm4, %v1518_v28, -inf }
 0xdae   :  { %1520 = vmax.xlane.f32.xlu1 %v1519_v29 }
 0xdaf   :  { %v1515_v30 = vpop.f32.mrf.mxu0 }
 0xdb1   :  { %v2102_v31 = vpop.f32.mrf.mxu0 }
 0xdbf   :  { %1531 = vrot.lane.b32.xlu1 %v2561_v16, %s2392_s9 }
 0xdc3   :  { %1622 = vrot.lane.b32.xlu1 %v2651_v56, %s2393_s24 }
 0xe37   :  { %v1521_v32 = vpop.xlane.xlu1 %1520 }
 0xe38   :  { %v1522_v33 = vsub.f32 %v1518_v28, %v1521_v32 }
 0xe3a   :  { %v1523_v34 = vmul.f32 1.442695, %v1522_v33 }
 0xe3b   :  { %v1532_v35 = vpop.permute.xlu1 %1531 }
 0xe3c   :  { %2199 = vpow2.f32 %v1523_v34  ;;  %2104 = vmatpush3.bf16.msra.mxu1 %v1532_v35 }
 0xe3d   :  { %2115 = vmatprep.subr.bf16.mxu1 %v2388_v0 }
 0xe3f   :  { %v1623_v46 = vpop.permute.xlu1 %1622 }
 0xe49   :  { %v2200_v36 = vpop.eup %2199 }
 0xe4a   :  { %v1525_v37 = vsel %vm568_vm4, %v2200_v36, 0.0 }
 0xe4b   :  { %1526 = vadd.xlane.f32.xlu0 %v1525_v37 }
 0xe61   :  { %1624 = vrot.lane.b32.xlu0 %v2521_v38, %s2393_s24 }
 0xed4   :  { %v1527_v39 = vpop.xlane.xlu0 %1526 }
 0xed5   :  { %2201 = vrcp.f32 %v1527_v39 }
 0xed8   :  { %v1625_v56 = vpop.permute.xlu0 %1624 }
 0xed9   :  { %v1630_v45 = vsel %vm514_vm1, %v1625_v56, 0 }
 0xee2   :  { %v2202_v43 = vpop.eup %2201 }
 0xee3   :  { %v1529_v44 = vmul.f32 %v2202_v43, %v2200_v36 }
 0xee5   :  { %v1530_v42 = vpack.c.bf16 %v1529_v44, %v1529_v44 }
 0xee7   :  { %2106 = vmatmul.mubr.msk.bf16.vlgmr.msra.gmra.mxu1 %vm568_vm4, %v1530_v42 }
 0xee8   :  { %2116 = vmatpush3.bf16.xpose.msra.mxu1 %v1630_v45  ;;  %2117 = vmatprep.mubr.msk.bf16.mxu1 %vm2389_vm0, %v2388_v0 }
 0xee9   :  { %2127 = vmatprep.subr.bf16.mxu1 %v2388_v0 }
 0xeef   :  { %2118 = vmatmul.mubr.msk.bf16.vlgmr.msra.gmra.mxu1 %vm514_vm1, %v1623_v46 }
 0xef0   :  { %2128 = vmatpush3.bf16.msra.mxu1 %v2662_v9  ;;  %2129 = vmatprep.mubr.msk.bf16.mxu1 %vm2389_vm0, %v2388_v0 }
 0xfa7   :  { %v1571_v38 = vpop.f32.mrf.mxu1 }
 0xfa8   :  { %v1577_v47 = vpack.c.bf16 %v1571_v38, %v1571_v38 }
 0xfa9   :  { %v2107_v48 = vpop.f32.mrf.mxu1 }
 0xfaa   :  { %2112 = vmatmul.mubr.msk.bf16.vlgmr.msra.gmra.mxu0 %vm514_vm1, %v1577_v47 }
 0xfab   :  { %v1574_v50 = vpop.f32.mrf.mxu1  ;;  %2123 = vmatprep.mubr.msk.bf16.mxu0 %vm2389_vm0, %v2388_v0 }
 0xfad   :  { %v2108_v51 = vpop.f32.mrf.mxu1 }
 0xfaf   :  { %v1666_v52 = vpop.f32.mrf.mxu1 }
 0xfb0   :  { %v1672_v53 = vsel %vm1210_vm7, %v1666_v52, -1e+09 }
 0xfb1   :  { %v2119_v55 = vpop.f32.mrf.mxu1  ;;  %v1673_v9 = vsel %vm568_vm4, %v1672_v53, -inf }
 0xfb2   :  { %1674 = vmax.xlane.f32.xlu1 %v1673_v9 }
 0xfb3   :  { %v1669_v3 = vpop.f32.mrf.mxu1 }
 0xfb5   :  { %v2120_v57 = vpop.f32.mrf.mxu1 }
 0xfc3   :  { %1685 = vrot.lane.b32.xlu1 %v2561_v16, %s2393_s24 }
0x103b   :  { %v1675_v58 = vpop.xlane.xlu1 %1674 }
0x103c   :  { %v1676_v59 = vsub.f32 %v1672_v53, %v1675_v58 }
0x103e   :  { %v1677_v61 = vmul.f32 1.442695, %v1676_v59 }
0x103f   :  { %v1686_v25 = vpop.permute.xlu1 %1685 }
0x1040   :  { %2203 = vpow2.f32 %v1677_v61  ;;  %2122 = vmatpush3.bf16.msra.mxu0 %v1686_v25 }
0x104d   :  { %v2204_v0 = vpop.eup %2203 }
0x104e   :  { %v1679_v2 = vsel %vm568_vm4, %v2204_v0, 0.0 }
0x104f   :  { %1680 = vadd.xlane.f32.xlu0 %v1679_v2 }
0x106a   :  { %v1615_v24 = vpop.f32.mrf.mxu0 }
0x106b   :  { %v1621_v41 = vadd.f32 %v1615_v24, %v2740_v26 }
0x106c   :  { %v2113_v4 = vpop.f32.mrf.mxu0 }
0x106e   :  { %v1618_v5 = vpop.f32.mrf.mxu0 }
0x1070   :  { %v2114_v6 = vpop.f32.mrf.mxu0 }
0x10d8   :  { %v1681_v7 = vpop.xlane.xlu0 %1680 }
0x10d9   :  { %2205 = vrcp.f32 %v1681_v7 }
0x10e6   :  { %v2206_v8 = vpop.eup %2205 }
0x10e7   :  { %v1683_v16 = vmul.f32 %v2206_v8, %v2204_v0 }
0x10e9   :  { %v1684_v10 = vpack.c.bf16 %v1683_v16, %v1683_v16 }
0x10eb   :  { %2124 = vmatmul.mubr.msk.bf16.vlgmr.msra.gmra.mxu0 %vm568_vm4, %v1684_v10 }
0x11ab   :  { %v1725_v12 = vpop.f32.mrf.mxu0 }
0x11ac   :  { %v1731_v13 = vpack.c.bf16 %v1725_v12, %v1725_v12 }
0x11ad   :  { %v2125_v14 = vpop.f32.mrf.mxu0 }
0x11ae   :  { %2130 = vmatmul.mubr.msk.bf16.vlgmr.msra.gmra.mxu1 %vm514_vm1, %v1731_v13 }
0x11af   :  { %v1728_v11 = vpop.f32.mrf.mxu0 }
0x11b1   :  { %v2126_v15 = vpop.f32.mrf.mxu0 }
0x126e   :  { %v1769_v60 = vpop.f32.mrf.mxu1 }
0x126f   :  { %v1775_v17 = vadd.f32 %v1769_v60, %v1621_v41 }
0x1270   :  { %v2131_v18 = vpop.f32.mrf.mxu1 }
0x1271   :  { %v1776_v19 = vadd.f32 %v2712_v49, %v1775_v17 }
0x1272   :  { %v1772_v20 = vpop.f32.mrf.mxu1 }
0x1273   :  { %1778 = vst [vmem:[#allocation14 + $0x8] sm:$0xff] %v1776_v19 }
0x1274   :  { %v2132_v21 = vpop.f32.mrf.mxu1 }
0x1275   :  { %2358 = shalt.err (!%p2355_p11)
}
0x1276   :  { %1790 = dma.vmem_to_hbm [thread:$0]  %s1785_s30, 256, %s2793_s12, [#allocation4], %s2379_s26, %s2379_s26, %s2380_s27  }
0x1277   :  { %2375 = dma.done.wait [#allocation4], 256  }
0x1278   :  { %2376 = vsyncadd [#allocation4], 4294967040 }
0x1279   :  { %1794 = vsyncpa [#allocation3], 1 }
0x127a   :  { %1795 = vsyncpa [#allocation6], 1 }
0x127b   :  { %1796 = vsyncpa [#allocation9], 1 }
0x127c   :  { %1797 = vsyncpa [#allocation12], 1 }
0x127d   :  { %1798 = vsyncpa [#allocation4], 1 }

</bundles_post_ra>
